<compile_context>
chip_gen: v7x
topology: tpu7x:2x2x1
jax: 0.10.0
libtpu: 0.0.40
codegen_flags: <defaults>
</compile_context>

<pallas_src>
import math
import jax
import jax.numpy as jnp
from jax.experimental import pallas as pl
from jax.experimental.pallas import tpu as pltpu  # noqa: F401  (TPU backend)

# -------------------- module-consistent shapes --------------------
B = 2                        # batch
IMG_C, IMG_H, IMG_W = 3, 16, 16
PATCH = 4
NP = (IMG_H // PATCH) * (IMG_W // PATCH)     # 16 patches
SV = NP + 1                  # visual seq len (patches + CLS), ViT convention
ST = 8                       # text seq len
VOCAB = 64
D = 32                       # hidden_dim
NH = 4                       # num_attention_heads
HD = D // NH                 # head_dim
CLS_H1, CLS_H2 = 64, 32      # classifier hidden dims
NUM_CLASSES = 16
PAD_CLASSES = 128            # lane-dense classifier width
LN_EPS = 1e-5
PATCH_DIM = IMG_C * PATCH * PATCH            # 48

# -------------------- packed layouts --------------------
SEQ_PAD = 32                 # per-batch padded sequence (8-aligned segments):
                             #   rows 0:16 patches, 16:24 text, 24 CLS, 25:32 pad
TOT = B * SEQ_PAD            # 64 stacked rows

SLAB_W = 128                 # lane-dense slab width
COL_TXT = PATCH_DIM          # 48: text-feature columns 48:80 in the act rows
COL_IND_PATCH = 80           # 1.0 on patch rows -> adds b_pe via embed matmul
COL_IND_CLS = 81             # 1.0 on CLS rows   -> adds cls token via embed matmul

# data slab rows (per call)
R_ACT = 0                    # [0:64)   activation rows [64, 128]
R_MASK = TOT                 # [64:128) additive attention mask [64, 64]
R_POOL = 2 * TOT             # [128:132) pooling selection rows [4, 64]
DATA_ROWS = 2 * TOT + 8      # 136

# param slab rows (packed once)
R_WEMB = 0                   # [128, 32] fused patch-embed / identity / bias / cls
R_WQKV = 128                 # [32, 96]  (Q columns pre-scaled by 1/sqrt(HD))
R_WO = 160                   # [32, 32]
R_WFV = 192                  # [32, 32]  fusion weight, visual half
R_WFT = 224                  # [32, 32]  fusion weight, text half
R_CW1 = 256                  # [32, 64]
R_CW2 = 288                  # [64, 32]
R_CW3 = 352                  # [32, 128]
R_VEC = 384                  # one bias / LN / head-mask vector per row
N_VEC = 14 + NH              # 18 vector rows
PARAM_ROWS = 408             # padded to a multiple of 8


# -------------------- in-kernel helpers --------------------
def _gelu(x):
    # tanh-approx GELU (see TODO(synk) in header)
    c = math.sqrt(2.0 / math.pi)
    return 0.5 * x * (1.0 + jnp.tanh(c * (x + 0.044715 * x * x * x)))


def _layernorm(x, gamma, beta):
    mu = jnp.mean(x, axis=-1, keepdims=True)
    var = jnp.mean((x - mu) ** 2, axis=-1, keepdims=True)
    return (x - mu) * jax.lax.rsqrt(var + LN_EPS) * gamma + beta


def _dot(a, b):
    return jnp.dot(a, b, preferred_element_type=jnp.float32)


# -------------------- single fused kernel --------------------
def mm_pill_kernel(data_ref, p_ref, logits_ref):
    # ---- static views into the packed param slab (no gathers, no concat) ----
    w_emb = p_ref[R_WEMB:R_WEMB + SLAB_W, 0:D]            # [128, 32]
    wqkv = p_ref[R_WQKV:R_WQKV + D, 0:3 * D]              # [32, 96]
    wo = p_ref[R_WO:R_WO + D, 0:D]                        # [32, 32]
    wf_v = p_ref[R_WFV:R_WFV + D, 0:D]                    # [32, 32]
    wf_t = p_ref[R_WFT:R_WFT + D, 0:D]                    # [32, 32]
    c_w1 = p_ref[R_CW1:R_CW1 + D, 0:CLS_H1]               # [32, 64]
    c_w2 = p_ref[R_CW2:R_CW2 + CLS_H1, 0:CLS_H2]          # [64, 32]
    c_w3 = p_ref[R_CW3:R_CW3 + CLS_H2, 0:PAD_CLASSES]     # [32, 128]

    def vec(i, n):
        return p_ref[R_VEC + i:R_VEC + i + 1, 0:n]        # [1, n]

    bqkv = vec(0, 3 * D)
    bo = vec(1, D)
    g_attn, b_attn = vec(2, D), vec(3, D)
    bf = vec(4, D)
    g_fuse, b_fuse = vec(5, D), vec(6, D)
    c_b1, c_g1, c_be1 = vec(7, CLS_H1), vec(8, CLS_H1), vec(9, CLS_H1)
    c_b2, c_g2, c_be2 = vec(10, CLS_H2), vec(11, CLS_H2), vec(12, CLS_H2)
    c_b3 = vec(13, PAD_CLASSES)
    head_masks = [vec(14 + h, D) for h in range(NH)]      # [1, 32] each

    # ---- data slab pieces ----
    act = data_ref[R_ACT:R_ACT + TOT, :]                  # [64, 128]
    add_mask = data_ref[R_MASK:R_MASK + TOT, 0:TOT]       # [64, 64]
    p_vis = data_ref[R_POOL:R_POOL + B, 0:TOT]            # [2, 64]
    p_txt = data_ref[R_POOL + B:R_POOL + 2 * B, 0:TOT]    # [2, 64]

    # ---- stacked sequence (patch-embed + text pass-through + CLS), one matmul ----
    seq = _dot(act, w_emb)                                # [64, 32]

    # ---- fused QKV projection (Q columns pre-scaled by 1/sqrt(HD)) ----
    qkv = _dot(seq, wqkv) + bqkv                          # [64, 96]
    q = qkv[:, 0:D]
    k = qkv[:, D:2 * D]
    v = qkv[:, 2 * D:3 * D]

    # ---- multi-head cross-modal attention (lane-masked heads, batched) ----
    attn_out = jnp.zeros((TOT, D), jnp.float32)
    for h in range(NH):
        hm = head_masks[h]                                # [1, 32]
        s = jax.lax.dot_general(q, k * hm, (((1,), (1,)), ((), ())),
                                preferred_element_type=jnp.float32) + add_mask
        s = s - jnp.max(s, axis=-1, keepdims=True)
        e = jnp.exp(s)
        p = e * pl.reciprocal(jnp.sum(e, axis=-1, keepdims=True), approx=True)
        attn_out = attn_out + _dot(p, v * hm)             # head h lanes only

    # output projection + residual + LayerNorm (shared weights, both modalities)
    attended = _layernorm(seq + _dot(attn_out, wo) + bo, g_attn, b_attn)   # [64, 32]

    # ---- pooling on the MXU (selection-matrix matmuls) + fusion ----
    v_pool = _dot(p_vis, attended)                        # [2, 32] visual mean (incl. CLS)
    t_pool = _dot(p_txt, attended)                        # [2, 32] masked text mean
    fused = _layernorm(_dot(v_pool, wf_v) + _dot(t_pool, wf_t) + bf,
                       g_fuse, b_fuse)                    # [2, 32]

    # ---- ClassificationHead: (Linear -> GELU -> LayerNorm) x2 -> Linear ----
    h1 = _layernorm(_gelu(_dot(fused, c_w1) + c_b1), c_g1, c_be1)   # [2, 64]
    h2 = _layernorm(_gelu(_dot(h1, c_w2) + c_b2), c_g2, c_be2)      # [2, 32]
    logits_ref[...] = _dot(h2, c_w3) + c_b3               # [2, 128] lane-dense


# -------------------- parameter init + one-time packing --------------------
def _xavier(key, fin, fout):
    limit = math.sqrt(6.0 / (fin + fout))
    return jax.random.uniform(key, (fin, fout), minval=-limit, maxval=limit,
                              dtype=jnp.float32)


def make_params(key):
    ks = jax.random.split(key, 12)
    # synthetic encoders (replace pretrained ViT / BERT backbones)
    w_pe = (jax.random.normal(ks[0], (PATCH_DIM, D)) * 0.02).astype(jnp.float32)
    b_pe = jnp.zeros((D,), jnp.float32)
    cls_tok = (jax.random.normal(ks[1], (D,)) * 0.02).astype(jnp.float32)
    tok_emb = (jax.random.normal(ks[2], (VOCAB, D)) * 0.02).astype(jnp.float32)
    # cross-modal attention (Linear: xavier, bias 0; LN: weight 1, bias 0)
    wq, wk, wv = _xavier(ks[3], D, D), _xavier(ks[4], D, D), _xavier(ks[5], D, D)
    wo = _xavier(ks[6], D, D)
    wf = _xavier(ks[7], 2 * D, D)
    c_w1 = _xavier(ks[8], D, CLS_H1)
    c_w2 = _xavier(ks[9], CLS_H1, CLS_H2)
    c_w3 = _xavier(ks[10], CLS_H2, NUM_CLASSES)

    zeros = lambda n: jnp.zeros((n,), jnp.float32)
    ones = lambda n: jnp.ones((n,), jnp.float32)

    # ---- fused embedding matrix: patch-embed rows ++ identity ++ b_pe ++ cls ----
    w_emb = jnp.zeros((SLAB_W, D), jnp.float32)
    w_emb = w_emb.at[0:PATCH_DIM].set(w_pe)
    w_emb = w_emb.at[COL_TXT:COL_TXT + D].set(jnp.eye(D, dtype=jnp.float32))
    w_emb = w_emb.at[COL_IND_PATCH].set(b_pe)
    w_emb = w_emb.at[COL_IND_CLS].set(cls_tok)

    # ---- fused QKV with 1/sqrt(head_dim) folded into the Q columns ----
    scale = 1.0 / math.sqrt(HD)
    wqkv = jnp.concatenate([wq * scale, wk, wv], axis=1)          # [32, 96]
    bqkv = jnp.concatenate([zeros(D) * scale, zeros(D), zeros(D)])  # [96]

    slab = jnp.zeros((PARAM_ROWS, SLAB_W), jnp.float32)

    def put(s, r, m):
        return s.at[r:r + m.shape[0], 0:m.shape[1]].set(m)

    slab = put(slab, R_WEMB, w_emb)
    slab = put(slab, R_WQKV, wqkv)
    slab = put(slab, R_WO, wo)
    slab = put(slab, R_WFV, wf[:D])
    slab = put(slab, R_WFT, wf[D:])
    slab = put(slab, R_CW1, c_w1)
    slab = put(slab, R_CW2, c_w2)
    slab = put(slab, R_CW3, jnp.pad(c_w3, ((0, 0), (0, PAD_CLASSES - NUM_CLASSES))))

    vec_rows = [
        bqkv,                       # 0
        zeros(D),                   # 1  bo
        ones(D), zeros(D),          # 2,3  attention LN gamma/beta
        zeros(D),                   # 4  bf
        ones(D), zeros(D),          # 5,6  fusion LN gamma/beta
        zeros(CLS_H1), ones(CLS_H1), zeros(CLS_H1),   # 7,8,9  c_b1, c_g1, c_be1
        zeros(CLS_H2), ones(CLS_H2), zeros(CLS_H2),   # 10,11,12 c_b2, c_g2, c_be2
        zeros(PAD_CLASSES),         # 13 c_b3
    ]
    for h in range(NH):             # 14..17 per-head lane masks
        vec_rows.append(((jnp.arange(D) // HD) == h).astype(jnp.float32))
    for i, vrow in enumerate(vec_rows):
        slab = slab.at[R_VEC + i, 0:vrow.shape[0]].set(vrow)

    return {"slab": slab, "tok_emb": tok_emb}


# -------------------- per-call data-slab construction (layout plumbing) --------------------
def patchify_nchw(images):
    b, c, h, w = images.shape
    x = images.reshape(b, c, h // PATCH, PATCH, w // PATCH, PATCH)
    x = jnp.transpose(x, (0, 2, 4, 1, 3, 5))            # [B, H/P, W/P, C, P, P]
    return x.reshape(b, NP, c * PATCH * PATCH)


def build_data_slab(images, input_ids, attention_mask, tok_emb):
    patches = patchify_nchw(images).astype(jnp.float32)           # [B, 16, 48]
    text = jnp.take(tok_emb, input_ids, axis=0)                   # [B, 8, 32]
    tmask = attention_mask.astype(jnp.float32)                    # [B, 8]

    # activation rows: patches | text | CLS indicator | pad, 8-aligned segments
    act = jnp.zeros((B, SEQ_PAD, SLAB_W), jnp.float32)
    act = act.at[:, 0:NP, 0:PATCH_DIM].set(patches)
    act = act.at[:, NP:NP + ST, COL_TXT:COL_TXT + D].set(text)
    act = act.at[:, 0:NP, COL_IND_PATCH].set(1.0)
    act = act.at[:, NP + ST, COL_IND_CLS].set(1.0)
    act = act.reshape(TOT, SLAB_W)

    # additive attention mask: bipartite within batch, block-diagonal across batch
    local = jnp.arange(SEQ_PAD)
    is_text = (local >= NP) & (local < NP + ST)
    is_vis = (local < NP) | (local == NP + ST)
    text_key_ok = jnp.zeros((B, SEQ_PAD), jnp.float32).at[:, NP:NP + ST].set(tmask)
    vis_key_ok = jnp.broadcast_to(is_vis.astype(jnp.float32), (B, SEQ_PAD))
    allowed_local = jnp.where(
        is_vis[None, :, None], text_key_ok[:, None, :],
        jnp.where(is_text[None, :, None], vis_key_ok[:, None, :], 0.0))  # [B,32,32]
    allowed = jnp.zeros((TOT, TOT), jnp.float32)
    for b in range(B):
        allowed = allowed.at[b * SEQ_PAD:(b + 1) * SEQ_PAD,
                             b * SEQ_PAD:(b + 1) * SEQ_PAD].set(allowed_local[b])
    add_mask = (allowed - 1.0) * 1e9                               # 0 / -1e9, finite

    # pooling selection rows: [0:2]=visual mean (incl. CLS), [2:4]=masked text mean
    pool = jnp.zeros((2 * B, TOT), jnp.float32)
    vis_w = is_vis.astype(jnp.float32) / float(SV)
    t_w = tmask / jnp.maximum(jnp.sum(tmask, axis=1, keepdims=True), 1e-9)
    for b in range(B):
        pool = pool.at[b, b * SEQ_PAD:(b + 1) * SEQ_PAD].set(vis_w)
        pool = pool.at[B + b, b * SEQ_PAD + NP:b * SEQ_PAD + NP + ST].set(t_w[b])

    data = jnp.zeros((DATA_ROWS, SLAB_W), jnp.float32)
    data = data.at[R_ACT:R_ACT + TOT, :].set(act)
    data = data.at[R_MASK:R_MASK + TOT, 0:TOT].set(add_mask)
    data = data.at[R_POOL:R_POOL + 2 * B, 0:TOT].set(pool)
    return data


# -------------------- full forward --------------------
def multimodal_forward(images, input_ids, attention_mask, params):
    data = build_data_slab(images, input_ids, attention_mask, params["tok_emb"])
    logits_pad = pl.pallas_call(
        mm_pill_kernel,
        out_shape=jax.ShapeDtypeStruct((B, PAD_CLASSES), jnp.float32),
    )(data, params["slab"])
    return {"logits": logits_pad[:, :NUM_CLASSES]}


# -------------------- main --------------------
if __name__ == "__main__":
    key = jax.random.PRNGKey(0)
    k_img, k_ids, k_par = jax.random.split(key, 3)

    images = jax.random.normal(k_img, (B, IMG_C, IMG_H, IMG_W), jnp.float32)
    input_ids = jax.random.randint(k_ids, (B, ST), 0, VOCAB, dtype=jnp.int32)
    attention_mask = jnp.array(
        [[1, 1, 1, 1, 1, 1, 0, 0],
         [1, 1, 1, 1, 0, 0, 0, 0]], dtype=jnp.int32)

    params = make_params(k_par)

    fwd = jax.jit(multimodal_forward)
    out = fwd(images, input_ids, attention_mask, params)
    logits = jax.block_until_ready(out["logits"])

    assert logits.shape == (B, NUM_CLASSES)
    assert bool(jnp.all(jnp.isfinite(logits)))
    print("KERNEL_OK")
</pallas_src>

<mosaic_0001>
module attributes {stable_mosaic.version = 11 : i64} {
  func.func @mm_pill_kernel(%arg0: memref<136x128xf32, #tpu.memory_space<vmem>>, %arg1: memref<408x128xf32, #tpu.memory_space<vmem>>, %arg2: memref<2x128xf32, #tpu.memory_space<vmem>>) attributes {dimension_semantics = [], scalar_prefetch = 0 : i64, scratch_operands = 0 : i64, tpu.core_type = #tpu.core_type<tc>} {
    %c0 = arith.constant 0 : index
    %c0_0 = arith.constant 0 : index
    %0 = vector.load %arg1[%c0, %c0_0] : memref<408x128xf32, #tpu.memory_space<vmem>>, vector<128x32xf32>
    %c128 = arith.constant 128 : index
    %c0_1 = arith.constant 0 : index
    %1 = vector.load %arg1[%c128, %c0_1] : memref<408x128xf32, #tpu.memory_space<vmem>>, vector<32x96xf32>
    %c160 = arith.constant 160 : index
    %c0_2 = arith.constant 0 : index
    %2 = vector.load %arg1[%c160, %c0_2] : memref<408x128xf32, #tpu.memory_space<vmem>>, vector<32x32xf32>
    %c192 = arith.constant 192 : index
    %c0_3 = arith.constant 0 : index
    %3 = vector.load %arg1[%c192, %c0_3] : memref<408x128xf32, #tpu.memory_space<vmem>>, vector<32x32xf32>
    %c224 = arith.constant 224 : index
    %c0_4 = arith.constant 0 : index
    %4 = vector.load %arg1[%c224, %c0_4] : memref<408x128xf32, #tpu.memory_space<vmem>>, vector<32x32xf32>
    %c256 = arith.constant 256 : index
    %c0_5 = arith.constant 0 : index
    %5 = vector.load %arg1[%c256, %c0_5] : memref<408x128xf32, #tpu.memory_space<vmem>>, vector<32x64xf32>
    %c288 = arith.constant 288 : index
    %c0_6 = arith.constant 0 : index
    %6 = vector.load %arg1[%c288, %c0_6] : memref<408x128xf32, #tpu.memory_space<vmem>>, vector<64x32xf32>
    %c352 = arith.constant 352 : index
    %c0_7 = arith.constant 0 : index
    %7 = vector.load %arg1[%c352, %c0_7] : memref<408x128xf32, #tpu.memory_space<vmem>>, vector<32x128xf32>
    %c384 = arith.constant 384 : index
    %c0_8 = arith.constant 0 : index
    %8 = vector.load %arg1[%c384, %c0_8] : memref<408x128xf32, #tpu.memory_space<vmem>>, vector<1x96xf32>
    %c385 = arith.constant 385 : index
    %c0_9 = arith.constant 0 : index
    %9 = vector.load %arg1[%c385, %c0_9] : memref<408x128xf32, #tpu.memory_space<vmem>>, vector<1x32xf32>
    %c386 = arith.constant 386 : index
    %c0_10 = arith.constant 0 : index
    %10 = vector.load %arg1[%c386, %c0_10] : memref<408x128xf32, #tpu.memory_space<vmem>>, vector<1x32xf32>
    %c387 = arith.constant 387 : index
    %c0_11 = arith.constant 0 : index
    %11 = vector.load %arg1[%c387, %c0_11] : memref<408x128xf32, #tpu.memory_space<vmem>>, vector<1x32xf32>
    %c388 = arith.constant 388 : index
    %c0_12 = arith.constant 0 : index
    %12 = vector.load %arg1[%c388, %c0_12] : memref<408x128xf32, #tpu.memory_space<vmem>>, vector<1x32xf32>
    %c389 = arith.constant 389 : index
    %c0_13 = arith.constant 0 : index
    %13 = vector.load %arg1[%c389, %c0_13] : memref<408x128xf32, #tpu.memory_space<vmem>>, vector<1x32xf32>
    %c390 = arith.constant 390 : index
    %c0_14 = arith.constant 0 : index
    %14 = vector.load %arg1[%c390, %c0_14] : memref<408x128xf32, #tpu.memory_space<vmem>>, vector<1x32xf32>
    %c391 = arith.constant 391 : index
    %c0_15 = arith.constant 0 : index
    %15 = vector.load %arg1[%c391, %c0_15] : memref<408x128xf32, #tpu.memory_space<vmem>>, vector<1x64xf32>
    %c392 = arith.constant 392 : index
    %c0_16 = arith.constant 0 : index
    %16 = vector.load %arg1[%c392, %c0_16] : memref<408x128xf32, #tpu.memory_space<vmem>>, vector<1x64xf32>
    %c393 = arith.constant 393 : index
    %c0_17 = arith.constant 0 : index
    %17 = vector.load %arg1[%c393, %c0_17] : memref<408x128xf32, #tpu.memory_space<vmem>>, vector<1x64xf32>
    %c394 = arith.constant 394 : index
    %c0_18 = arith.constant 0 : index
    %18 = vector.load %arg1[%c394, %c0_18] : memref<408x128xf32, #tpu.memory_space<vmem>>, vector<1x32xf32>
    %c395 = arith.constant 395 : index
    %c0_19 = arith.constant 0 : index
    %19 = vector.load %arg1[%c395, %c0_19] : memref<408x128xf32, #tpu.memory_space<vmem>>, vector<1x32xf32>
    %c396 = arith.constant 396 : index
    %c0_20 = arith.constant 0 : index
    %20 = vector.load %arg1[%c396, %c0_20] : memref<408x128xf32, #tpu.memory_space<vmem>>, vector<1x32xf32>
    %c397 = arith.constant 397 : index
    %c0_21 = arith.constant 0 : index
    %21 = vector.load %arg1[%c397, %c0_21] : memref<408x128xf32, #tpu.memory_space<vmem>>, vector<1x128xf32>
    %c398 = arith.constant 398 : index
    %c0_22 = arith.constant 0 : index
    %22 = vector.load %arg1[%c398, %c0_22] : memref<408x128xf32, #tpu.memory_space<vmem>>, vector<1x32xf32>
    %c399 = arith.constant 399 : index
    %c0_23 = arith.constant 0 : index
    %23 = vector.load %arg1[%c399, %c0_23] : memref<408x128xf32, #tpu.memory_space<vmem>>, vector<1x32xf32>
    %c400 = arith.constant 400 : index
    %c0_24 = arith.constant 0 : index
    %24 = vector.load %arg1[%c400, %c0_24] : memref<408x128xf32, #tpu.memory_space<vmem>>, vector<1x32xf32>
    %c401 = arith.constant 401 : index
    %c0_25 = arith.constant 0 : index
    %25 = vector.load %arg1[%c401, %c0_25] : memref<408x128xf32, #tpu.memory_space<vmem>>, vector<1x32xf32>
    %c0_26 = arith.constant 0 : index
    %c0_27 = arith.constant 0 : index
    %26 = vector.load %arg0[%c0_26, %c0_27] : memref<136x128xf32, #tpu.memory_space<vmem>>, vector<64x128xf32>
    %c64 = arith.constant 64 : index
    %c0_28 = arith.constant 0 : index
    %27 = vector.load %arg0[%c64, %c0_28] : memref<136x128xf32, #tpu.memory_space<vmem>>, vector<64x64xf32>
    %c128_29 = arith.constant 128 : index
    %c0_30 = arith.constant 0 : index
    %28 = vector.load %arg0[%c128_29, %c0_30] : memref<136x128xf32, #tpu.memory_space<vmem>>, vector<2x64xf32>
    %c130 = arith.constant 130 : index
    %c0_31 = arith.constant 0 : index
    %29 = vector.load %arg0[%c130, %c0_31] : memref<136x128xf32, #tpu.memory_space<vmem>>, vector<2x64xf32>
    %cst = arith.constant dense<0.000000e+00> : vector<64x32xf32>
    %30 = tpu.matmul %26, %0, %cst {dimension_numbers = #tpu.dot_dimension_numbers<[1], [0], [0], [1], [0, 0, 1, 1], [], []>} : vector<64x128xf32>, vector<128x32xf32>, vector<64x32xf32> -> vector<64x32xf32>
    %cst_32 = arith.constant dense<0.000000e+00> : vector<64x96xf32>
    %31 = tpu.matmul %30, %1, %cst_32 {dimension_numbers = #tpu.dot_dimension_numbers<[1], [0], [0], [1], [0, 0, 1, 1], [], []>} : vector<64x32xf32>, vector<32x96xf32>, vector<64x96xf32> -> vector<64x96xf32>
    %32 = vector.broadcast %8 : vector<1x96xf32> to vector<64x96xf32>
    %33 = arith.addf %31, %32 : vector<64x96xf32>
    %34 = vector.extract_strided_slice %33 {offsets = [0, 0], sizes = [64, 32], strides = [1, 1]} : vector<64x96xf32> to vector<64x32xf32>
    %35 = vector.extract_strided_slice %33 {offsets = [0, 32], sizes = [64, 32], strides = [1, 1]} : vector<64x96xf32> to vector<64x32xf32>
    %36 = vector.extract_strided_slice %33 {offsets = [0, 64], sizes = [64, 32], strides = [1, 1]} : vector<64x96xf32> to vector<64x32xf32>
    %cst_33 = arith.constant 0.000000e+00 : f32
    %37 = vector.broadcast %cst_33 : f32 to vector<64x32xf32>
    %38 = vector.broadcast %22 : vector<1x32xf32> to vector<64x32xf32>
    %39 = arith.mulf %35, %38 : vector<64x32xf32>
    %cst_34 = arith.constant dense<0.000000e+00> : vector<64x64xf32>
    %40 = tpu.matmul %34, %39, %cst_34 {dimension_numbers = #tpu.dot_dimension_numbers<[1], [1], [0], [0], [0, 0, 1, 0], [], []>} : vector<64x32xf32>, vector<64x32xf32>, vector<64x64xf32> -> vector<64x64xf32>
    %41 = arith.addf %40, %27 : vector<64x64xf32>
    %cst_35 = arith.constant dense<0xFF800000> : vector<64xf32>
    %42 = vector.multi_reduction <maximumf>, %41, %cst_35 [1] : vector<64x64xf32> to vector<64xf32>
    %43 = vector.shape_cast %42 : vector<64xf32> to vector<64x1xf32>
    %44 = vector.broadcast %43 : vector<64x1xf32> to vector<64x64xf32>
    %45 = arith.subf %41, %44 : vector<64x64xf32>
    %46 = math.exp %45 : vector<64x64xf32>
    %cst_36 = arith.constant dense<0.000000e+00> : vector<64xf32>
    %47 = vector.multi_reduction <add>, %46, %cst_36 [1] : vector<64x64xf32> to vector<64xf32>
    %48 = vector.shape_cast %47 : vector<64xf32> to vector<64x1xf32>
    %49 = tpu.reciprocal %48 {approx = true} : vector<64x1xf32> -> vector<64x1xf32>
    %50 = vector.broadcast %49 : vector<64x1xf32> to vector<64x64xf32>
    %51 = arith.mulf %46, %50 : vector<64x64xf32>
    %52 = vector.broadcast %22 : vector<1x32xf32> to vector<64x32xf32>
    %53 = arith.mulf %36, %52 : vector<64x32xf32>
    %cst_37 = arith.constant dense<0.000000e+00> : vector<64x32xf32>
    %54 = tpu.matmul %51, %53, %cst_37 {dimension_numbers = #tpu.dot_dimension_numbers<[1], [0], [0], [1], [0, 0, 1, 1], [], []>} : vector<64x64xf32>, vector<64x32xf32>, vector<64x32xf32> -> vector<64x32xf32>
    %55 = arith.addf %37, %54 : vector<64x32xf32>
    %56 = vector.broadcast %23 : vector<1x32xf32> to vector<64x32xf32>
    %57 = arith.mulf %35, %56 : vector<64x32xf32>
    %cst_38 = arith.constant dense<0.000000e+00> : vector<64x64xf32>
    %58 = tpu.matmul %34, %57, %cst_38 {dimension_numbers = #tpu.dot_dimension_numbers<[1], [1], [0], [0], [0, 0, 1, 0], [], []>} : vector<64x32xf32>, vector<64x32xf32>, vector<64x64xf32> -> vector<64x64xf32>
    %59 = arith.addf %58, %27 : vector<64x64xf32>
    %cst_39 = arith.constant dense<0xFF800000> : vector<64xf32>
    %60 = vector.multi_reduction <maximumf>, %59, %cst_39 [1] : vector<64x64xf32> to vector<64xf32>
    %61 = vector.shape_cast %60 : vector<64xf32> to vector<64x1xf32>
    %62 = vector.broadcast %61 : vector<64x1xf32> to vector<64x64xf32>
    %63 = arith.subf %59, %62 : vector<64x64xf32>
    %64 = math.exp %63 : vector<64x64xf32>
    %cst_40 = arith.constant dense<0.000000e+00> : vector<64xf32>
    %65 = vector.multi_reduction <add>, %64, %cst_40 [1] : vector<64x64xf32> to vector<64xf32>
    %66 = vector.shape_cast %65 : vector<64xf32> to vector<64x1xf32>
    %67 = tpu.reciprocal %66 {approx = true} : vector<64x1xf32> -> vector<64x1xf32>
    %68 = vector.broadcast %67 : vector<64x1xf32> to vector<64x64xf32>
    %69 = arith.mulf %64, %68 : vector<64x64xf32>
    %70 = vector.broadcast %23 : vector<1x32xf32> to vector<64x32xf32>
    %71 = arith.mulf %36, %70 : vector<64x32xf32>
    %cst_41 = arith.constant dense<0.000000e+00> : vector<64x32xf32>
    %72 = tpu.matmul %69, %71, %cst_41 {dimension_numbers = #tpu.dot_dimension_numbers<[1], [0], [0], [1], [0, 0, 1, 1], [], []>} : vector<64x64xf32>, vector<64x32xf32>, vector<64x32xf32> -> vector<64x32xf32>
    %73 = arith.addf %55, %72 : vector<64x32xf32>
    %74 = vector.broadcast %24 : vector<1x32xf32> to vector<64x32xf32>
    %75 = arith.mulf %35, %74 : vector<64x32xf32>
    %cst_42 = arith.constant dense<0.000000e+00> : vector<64x64xf32>
    %76 = tpu.matmul %34, %75, %cst_42 {dimension_numbers = #tpu.dot_dimension_numbers<[1], [1], [0], [0], [0, 0, 1, 0], [], []>} : vector<64x32xf32>, vector<64x32xf32>, vector<64x64xf32> -> vector<64x64xf32>
    %77 = arith.addf %76, %27 : vector<64x64xf32>
    %cst_43 = arith.constant dense<0xFF800000> : vector<64xf32>
    %78 = vector.multi_reduction <maximumf>, %77, %cst_43 [1] : vector<64x64xf32> to vector<64xf32>
    %79 = vector.shape_cast %78 : vector<64xf32> to vector<64x1xf32>
    %80 = vector.broadcast %79 : vector<64x1xf32> to vector<64x64xf32>
    %81 = arith.subf %77, %80 : vector<64x64xf32>
    %82 = math.exp %81 : vector<64x64xf32>
    %cst_44 = arith.constant dense<0.000000e+00> : vector<64xf32>
    %83 = vector.multi_reduction <add>, %82, %cst_44 [1] : vector<64x64xf32> to vector<64xf32>
    %84 = vector.shape_cast %83 : vector<64xf32> to vector<64x1xf32>
    %85 = tpu.reciprocal %84 {approx = true} : vector<64x1xf32> -> vector<64x1xf32>
    %86 = vector.broadcast %85 : vector<64x1xf32> to vector<64x64xf32>
    %87 = arith.mulf %82, %86 : vector<64x64xf32>
    %88 = vector.broadcast %24 : vector<1x32xf32> to vector<64x32xf32>
    %89 = arith.mulf %36, %88 : vector<64x32xf32>
    %cst_45 = arith.constant dense<0.000000e+00> : vector<64x32xf32>
    %90 = tpu.matmul %87, %89, %cst_45 {dimension_numbers = #tpu.dot_dimension_numbers<[1], [0], [0], [1], [0, 0, 1, 1], [], []>} : vector<64x64xf32>, vector<64x32xf32>, vector<64x32xf32> -> vector<64x32xf32>
    %91 = arith.addf %73, %90 : vector<64x32xf32>
    %92 = vector.broadcast %25 : vector<1x32xf32> to vector<64x32xf32>
    %93 = arith.mulf %35, %92 : vector<64x32xf32>
    %cst_46 = arith.constant dense<0.000000e+00> : vector<64x64xf32>
    %94 = tpu.matmul %34, %93, %cst_46 {dimension_numbers = #tpu.dot_dimension_numbers<[1], [1], [0], [0], [0, 0, 1, 0], [], []>} : vector<64x32xf32>, vector<64x32xf32>, vector<64x64xf32> -> vector<64x64xf32>
    %95 = arith.addf %94, %27 : vector<64x64xf32>
    %cst_47 = arith.constant dense<0xFF800000> : vector<64xf32>
    %96 = vector.multi_reduction <maximumf>, %95, %cst_47 [1] : vector<64x64xf32> to vector<64xf32>
    %97 = vector.shape_cast %96 : vector<64xf32> to vector<64x1xf32>
    %98 = vector.broadcast %97 : vector<64x1xf32> to vector<64x64xf32>
    %99 = arith.subf %95, %98 : vector<64x64xf32>
    %100 = math.exp %99 : vector<64x64xf32>
    %cst_48 = arith.constant dense<0.000000e+00> : vector<64xf32>
    %101 = vector.multi_reduction <add>, %100, %cst_48 [1] : vector<64x64xf32> to vector<64xf32>
    %102 = vector.shape_cast %101 : vector<64xf32> to vector<64x1xf32>
    %103 = tpu.reciprocal %102 {approx = true} : vector<64x1xf32> -> vector<64x1xf32>
    %104 = vector.broadcast %103 : vector<64x1xf32> to vector<64x64xf32>
    %105 = arith.mulf %100, %104 : vector<64x64xf32>
    %106 = vector.broadcast %25 : vector<1x32xf32> to vector<64x32xf32>
    %107 = arith.mulf %36, %106 : vector<64x32xf32>
    %cst_49 = arith.constant dense<0.000000e+00> : vector<64x32xf32>
    %108 = tpu.matmul %105, %107, %cst_49 {dimension_numbers = #tpu.dot_dimension_numbers<[1], [0], [0], [1], [0, 0, 1, 1], [], []>} : vector<64x64xf32>, vector<64x32xf32>, vector<64x32xf32> -> vector<64x32xf32>
    %109 = arith.addf %91, %108 : vector<64x32xf32>
    %cst_50 = arith.constant dense<0.000000e+00> : vector<64x32xf32>
    %110 = tpu.matmul %109, %2, %cst_50 {dimension_numbers = #tpu.dot_dimension_numbers<[1], [0], [0], [1], [0, 0, 1, 1], [], []>} : vector<64x32xf32>, vector<32x32xf32>, vector<64x32xf32> -> vector<64x32xf32>
    %111 = arith.addf %30, %110 : vector<64x32xf32>
    %112 = vector.broadcast %9 : vector<1x32xf32> to vector<64x32xf32>
    %113 = arith.addf %111, %112 : vector<64x32xf32>
    %cst_51 = arith.constant dense<0.000000e+00> : vector<64xf32>
    %114 = vector.multi_reduction <add>, %113, %cst_51 [1] : vector<64x32xf32> to vector<64xf32>
    %115 = vector.shape_cast %114 : vector<64xf32> to vector<64x1xf32>
    %cst_52 = arith.constant 3.200000e+01 : f32
    %116 = vector.broadcast %cst_52 : f32 to vector<64x1xf32>
    %117 = arith.divf %115, %116 : vector<64x1xf32>
    %118 = vector.broadcast %117 : vector<64x1xf32> to vector<64x32xf32>
    %119 = arith.subf %113, %118 : vector<64x32xf32>
    %120 = arith.mulf %119, %119 : vector<64x32xf32>
    %cst_53 = arith.constant dense<0.000000e+00> : vector<64xf32>
    %121 = vector.multi_reduction <add>, %120, %cst_53 [1] : vector<64x32xf32> to vector<64xf32>
    %122 = vector.shape_cast %121 : vector<64xf32> to vector<64x1xf32>
    %cst_54 = arith.constant 3.200000e+01 : f32
    %123 = vector.broadcast %cst_54 : f32 to vector<64x1xf32>
    %124 = arith.divf %122, %123 : vector<64x1xf32>
    %125 = vector.broadcast %117 : vector<64x1xf32> to vector<64x32xf32>
    %126 = arith.subf %113, %125 : vector<64x32xf32>
    %cst_55 = arith.constant 9.99999974E-6 : f32
    %127 = vector.broadcast %cst_55 : f32 to vector<64x1xf32>
    %128 = arith.addf %124, %127 : vector<64x1xf32>
    %129 = math.rsqrt %128 : vector<64x1xf32>
    %130 = vector.broadcast %129 : vector<64x1xf32> to vector<64x32xf32>
    %131 = arith.mulf %126, %130 : vector<64x32xf32>
    %132 = vector.broadcast %10 : vector<1x32xf32> to vector<64x32xf32>
    %133 = arith.mulf %131, %132 : vector<64x32xf32>
    %134 = vector.broadcast %11 : vector<1x32xf32> to vector<64x32xf32>
    %135 = arith.addf %133, %134 : vector<64x32xf32>
    %cst_56 = arith.constant dense<0.000000e+00> : vector<2x32xf32>
    %136 = tpu.matmul %28, %135, %cst_56 {dimension_numbers = #tpu.dot_dimension_numbers<[1], [0], [0], [1], [0, 0, 1, 1], [], []>} : vector<2x64xf32>, vector<64x32xf32>, vector<2x32xf32> -> vector<2x32xf32>
    %cst_57 = arith.constant dense<0.000000e+00> : vector<2x32xf32>
    %137 = tpu.matmul %29, %135, %cst_57 {dimension_numbers = #tpu.dot_dimension_numbers<[1], [0], [0], [1], [0, 0, 1, 1], [], []>} : vector<2x64xf32>, vector<64x32xf32>, vector<2x32xf32> -> vector<2x32xf32>
    %cst_58 = arith.constant dense<0.000000e+00> : vector<2x32xf32>
    %138 = tpu.matmul %136, %3, %cst_58 {dimension_numbers = #tpu.dot_dimension_numbers<[1], [0], [0], [1], [0, 0, 1, 1], [], []>} : vector<2x32xf32>, vector<32x32xf32>, vector<2x32xf32> -> vector<2x32xf32>
    %cst_59 = arith.constant dense<0.000000e+00> : vector<2x32xf32>
    %139 = tpu.matmul %137, %4, %cst_59 {dimension_numbers = #tpu.dot_dimension_numbers<[1], [0], [0], [1], [0, 0, 1, 1], [], []>} : vector<2x32xf32>, vector<32x32xf32>, vector<2x32xf32> -> vector<2x32xf32>
    %140 = arith.addf %138, %139 : vector<2x32xf32>
    %141 = vector.broadcast %12 : vector<1x32xf32> to vector<2x32xf32>
    %142 = arith.addf %140, %141 : vector<2x32xf32>
    %cst_60 = arith.constant dense<0.000000e+00> : vector<2xf32>
    %143 = vector.multi_reduction <add>, %142, %cst_60 [1] : vector<2x32xf32> to vector<2xf32>
    %144 = vector.shape_cast %143 : vector<2xf32> to vector<2x1xf32>
    %cst_61 = arith.constant 3.200000e+01 : f32
    %145 = vector.broadcast %cst_61 : f32 to vector<2x1xf32>
    %146 = arith.divf %144, %145 : vector<2x1xf32>
    %147 = vector.broadcast %146 : vector<2x1xf32> to vector<2x32xf32>
    %148 = arith.subf %142, %147 : vector<2x32xf32>
    %149 = arith.mulf %148, %148 : vector<2x32xf32>
    %cst_62 = arith.constant dense<0.000000e+00> : vector<2xf32>
    %150 = vector.multi_reduction <add>, %149, %cst_62 [1] : vector<2x32xf32> to vector<2xf32>
    %151 = vector.shape_cast %150 : vector<2xf32> to vector<2x1xf32>
    %cst_63 = arith.constant 3.200000e+01 : f32
    %152 = vector.broadcast %cst_63 : f32 to vector<2x1xf32>
    %153 = arith.divf %151, %152 : vector<2x1xf32>
    %154 = vector.broadcast %146 : vector<2x1xf32> to vector<2x32xf32>
    %155 = arith.subf %142, %154 : vector<2x32xf32>
    %cst_64 = arith.constant 9.99999974E-6 : f32
    %156 = vector.broadcast %cst_64 : f32 to vector<2x1xf32>
    %157 = arith.addf %153, %156 : vector<2x1xf32>
    %158 = math.rsqrt %157 : vector<2x1xf32>
    %159 = vector.broadcast %158 : vector<2x1xf32> to vector<2x32xf32>
    %160 = arith.mulf %155, %159 : vector<2x32xf32>
    %161 = vector.broadcast %13 : vector<1x32xf32> to vector<2x32xf32>
    %162 = arith.mulf %160, %161 : vector<2x32xf32>
    %163 = vector.broadcast %14 : vector<1x32xf32> to vector<2x32xf32>
    %164 = arith.addf %162, %163 : vector<2x32xf32>
    %cst_65 = arith.constant dense<0.000000e+00> : vector<2x64xf32>
    %165 = tpu.matmul %164, %5, %cst_65 {dimension_numbers = #tpu.dot_dimension_numbers<[1], [0], [0], [1], [0, 0, 1, 1], [], []>} : vector<2x32xf32>, vector<32x64xf32>, vector<2x64xf32> -> vector<2x64xf32>
    %166 = vector.broadcast %15 : vector<1x64xf32> to vector<2x64xf32>
    %167 = arith.addf %165, %166 : vector<2x64xf32>
    %cst_66 = arith.constant 5.000000e-01 : f32
    %168 = vector.broadcast %cst_66 : f32 to vector<2x64xf32>
    %169 = arith.mulf %168, %167 : vector<2x64xf32>
    %cst_67 = arith.constant 4.471500e-02 : f32
    %170 = vector.broadcast %cst_67 : f32 to vector<2x64xf32>
    %171 = arith.mulf %170, %167 : vector<2x64xf32>
    %172 = arith.mulf %171, %167 : vector<2x64xf32>
    %173 = arith.mulf %172, %167 : vector<2x64xf32>
    %174 = arith.addf %167, %173 : vector<2x64xf32>
    %cst_68 = arith.constant 0.797884583 : f32
    %175 = vector.broadcast %cst_68 : f32 to vector<2x64xf32>
    %176 = arith.mulf %175, %174 : vector<2x64xf32>
    %177 = math.tanh %176 : vector<2x64xf32>
    %cst_69 = arith.constant 1.000000e+00 : f32
    %178 = vector.broadcast %cst_69 : f32 to vector<2x64xf32>
    %179 = arith.addf %178, %177 : vector<2x64xf32>
    %180 = arith.mulf %169, %179 : vector<2x64xf32>
    %cst_70 = arith.constant dense<0.000000e+00> : vector<2xf32>
    %181 = vector.multi_reduction <add>, %180, %cst_70 [1] : vector<2x64xf32> to vector<2xf32>
    %182 = vector.shape_cast %181 : vector<2xf32> to vector<2x1xf32>
    %cst_71 = arith.constant 6.400000e+01 : f32
    %183 = vector.broadcast %cst_71 : f32 to vector<2x1xf32>
    %184 = arith.divf %182, %183 : vector<2x1xf32>
    %185 = vector.broadcast %184 : vector<2x1xf32> to vector<2x64xf32>
    %186 = arith.subf %180, %185 : vector<2x64xf32>
    %187 = arith.mulf %186, %186 : vector<2x64xf32>
    %cst_72 = arith.constant dense<0.000000e+00> : vector<2xf32>
    %188 = vector.multi_reduction <add>, %187, %cst_72 [1] : vector<2x64xf32> to vector<2xf32>
    %189 = vector.shape_cast %188 : vector<2xf32> to vector<2x1xf32>
    %cst_73 = arith.constant 6.400000e+01 : f32
    %190 = vector.broadcast %cst_73 : f32 to vector<2x1xf32>
    %191 = arith.divf %189, %190 : vector<2x1xf32>
    %192 = vector.broadcast %184 : vector<2x1xf32> to vector<2x64xf32>
    %193 = arith.subf %180, %192 : vector<2x64xf32>
    %cst_74 = arith.constant 9.99999974E-6 : f32
    %194 = vector.broadcast %cst_74 : f32 to vector<2x1xf32>
    %195 = arith.addf %191, %194 : vector<2x1xf32>
    %196 = math.rsqrt %195 : vector<2x1xf32>
    %197 = vector.broadcast %196 : vector<2x1xf32> to vector<2x64xf32>
    %198 = arith.mulf %193, %197 : vector<2x64xf32>
    %199 = vector.broadcast %16 : vector<1x64xf32> to vector<2x64xf32>
    %200 = arith.mulf %198, %199 : vector<2x64xf32>
    %201 = vector.broadcast %17 : vector<1x64xf32> to vector<2x64xf32>
    %202 = arith.addf %200, %201 : vector<2x64xf32>
    %cst_75 = arith.constant dense<0.000000e+00> : vector<2x32xf32>
    %203 = tpu.matmul %202, %6, %cst_75 {dimension_numbers = #tpu.dot_dimension_numbers<[1], [0], [0], [1], [0, 0, 1, 1], [], []>} : vector<2x64xf32>, vector<64x32xf32>, vector<2x32xf32> -> vector<2x32xf32>
    %204 = vector.broadcast %18 : vector<1x32xf32> to vector<2x32xf32>
    %205 = arith.addf %203, %204 : vector<2x32xf32>
    %cst_76 = arith.constant 5.000000e-01 : f32
    %206 = vector.broadcast %cst_76 : f32 to vector<2x32xf32>
    %207 = arith.mulf %206, %205 : vector<2x32xf32>
    %cst_77 = arith.constant 4.471500e-02 : f32
    %208 = vector.broadcast %cst_77 : f32 to vector<2x32xf32>
    %209 = arith.mulf %208, %205 : vector<2x32xf32>
    %210 = arith.mulf %209, %205 : vector<2x32xf32>
    %211 = arith.mulf %210, %205 : vector<2x32xf32>
    %212 = arith.addf %205, %211 : vector<2x32xf32>
    %cst_78 = arith.constant 0.797884583 : f32
    %213 = vector.broadcast %cst_78 : f32 to vector<2x32xf32>
    %214 = arith.mulf %213, %212 : vector<2x32xf32>
    %215 = math.tanh %214 : vector<2x32xf32>
    %cst_79 = arith.constant 1.000000e+00 : f32
    %216 = vector.broadcast %cst_79 : f32 to vector<2x32xf32>
    %217 = arith.addf %216, %215 : vector<2x32xf32>
    %218 = arith.mulf %207, %217 : vector<2x32xf32>
    %cst_80 = arith.constant dense<0.000000e+00> : vector<2xf32>
    %219 = vector.multi_reduction <add>, %218, %cst_80 [1] : vector<2x32xf32> to vector<2xf32>
    %220 = vector.shape_cast %219 : vector<2xf32> to vector<2x1xf32>
    %cst_81 = arith.constant 3.200000e+01 : f32
    %221 = vector.broadcast %cst_81 : f32 to vector<2x1xf32>
    %222 = arith.divf %220, %221 : vector<2x1xf32>
    %223 = vector.broadcast %222 : vector<2x1xf32> to vector<2x32xf32>
    %224 = arith.subf %218, %223 : vector<2x32xf32>
    %225 = arith.mulf %224, %224 : vector<2x32xf32>
    %cst_82 = arith.constant dense<0.000000e+00> : vector<2xf32>
    %226 = vector.multi_reduction <add>, %225, %cst_82 [1] : vector<2x32xf32> to vector<2xf32>
    %227 = vector.shape_cast %226 : vector<2xf32> to vector<2x1xf32>
    %cst_83 = arith.constant 3.200000e+01 : f32
    %228 = vector.broadcast %cst_83 : f32 to vector<2x1xf32>
    %229 = arith.divf %227, %228 : vector<2x1xf32>
    %230 = vector.broadcast %222 : vector<2x1xf32> to vector<2x32xf32>
    %231 = arith.subf %218, %230 : vector<2x32xf32>
    %cst_84 = arith.constant 9.99999974E-6 : f32
    %232 = vector.broadcast %cst_84 : f32 to vector<2x1xf32>
    %233 = arith.addf %229, %232 : vector<2x1xf32>
    %234 = math.rsqrt %233 : vector<2x1xf32>
    %235 = vector.broadcast %234 : vector<2x1xf32> to vector<2x32xf32>
    %236 = arith.mulf %231, %235 : vector<2x32xf32>
    %237 = vector.broadcast %19 : vector<1x32xf32> to vector<2x32xf32>
    %238 = arith.mulf %236, %237 : vector<2x32xf32>
    %239 = vector.broadcast %20 : vector<1x32xf32> to vector<2x32xf32>
    %240 = arith.addf %238, %239 : vector<2x32xf32>
    %cst_85 = arith.constant dense<0.000000e+00> : vector<2x128xf32>
    %241 = tpu.matmul %240, %7, %cst_85 {dimension_numbers = #tpu.dot_dimension_numbers<[1], [0], [0], [1], [0, 0, 1, 1], [], []>} : vector<2x32xf32>, vector<32x128xf32>, vector<2x128xf32> -> vector<2x128xf32>
    %242 = vector.broadcast %21 : vector<1x128xf32> to vector<2x128xf32>
    %243 = arith.addf %241, %242 : vector<2x128xf32>
    %c0_86 = arith.constant 0 : index
    %c0_87 = arith.constant 0 : index
    %244 = vector.load %arg2[%c0_86, %c0_87] : memref<2x128xf32, #tpu.memory_space<vmem>>, vector<2x128xf32>
    tpu.vector_store %arg2[%c0_86, %c0_87], %243 {strides = array<i32>} : memref<2x128xf32, #tpu.memory_space<vmem>>, vector<2x128xf32>,
    return
  }
}

</mosaic_0001>

<bundles_post_ra>
// kernel: multimodal_forward.1
= control target key start
LH: loop header
LB: loop body
LE: loop exit
PB: predicated region body
PF: predicated region fallthrough
CT: control target
= control target key end

     0   :  { %s5498_s0 = inlined_call_operand.vmem [shape: f32[136,128], index: 0, kind: input, shape index: {}]   ;;  %s5499_s1 = inlined_call_operand.vmem [shape: f32[408,128], index: 1, kind: input, shape index: {}]   ;;  %s5500_s2 = inlined_call_operand.hbm [shape: f32[2,128], index: 2, kind: output, shape index: {}]  }
   0x1   :  { %v12_v0 = vld [vmem:[%s5499_s1] sm:$0xff]  ;;  %v13_v1 = vld [vmem:[%s5499_s1 + $0x8] sm:$0xff]  ;;  %v14_v2 = vld [vmem:[%s5499_s1 + $0x10] sm:$0xff] }
   0x2   :  { %v3740_v3 = vpack.c.bf16 %v13_v1, %v12_v0  ;;  %v15_v4 = vld [vmem:[%s5499_s1 + $0x18] sm:$0xff]  ;;  %v16_v6 = vld [vmem:[%s5499_s1 + $0x20] sm:$0xff]  ;;  %v17_v7 = vld [vmem:[%s5499_s1 + $0x28] sm:$0xff] }
   0x3   :  { %v3744_v5 = vpack.c.bf16 %v15_v4, %v14_v2  ;;  %v3748_v8 = vpack.c.bf16 %v17_v7, %v16_v6  ;;  %v78_v9 = vld [vmem:[%s5498_s0] sm:$0xff]  ;;  %v18_v10 = vld [vmem:[%s5499_s1 + $0x30] sm:$0xff]  ;;  %v19_v11 = vld [vmem:[%s5499_s1 + $0x38] sm:$0xff] }
   0x4   :  { %3741 = vmatprep.subr.bf16.mxu0 %v3740_v3  ;;  %3363 = vmatprep.mubr.f32.mxu0 %v78_v9  ;;  %v28_v12 = vld [vmem:[%s5499_s1 + $0x80] sm:$0xff]  ;;  %v29_v13 = vld [vmem:[%s5499_s1 + $0x88] sm:$0xff]  ;;  %v30_v14 = vld [vmem:[%s5499_s1 + $0x90] sm:$0xff]  ;;  %v3752_v15 = vpack.c.bf16 %v19_v11, %v18_v10 }
   0x5   :  { %3743 = vmatpush3.bf16.msra.mxu0 %v3740_v3  ;;  %v3772_v16 = vpack.c.bf16 %v29_v13, %v28_v12  ;;  %v31_v17 = vld [vmem:[%s5499_s1 + $0x98] sm:$0xff] }
   0x6   :  { %3745 = vmatprep.subr.bf16.mxu0 %v3744_v5 }
   0x9   :  { %3747 = vmatpush3.bf16.msra.mxu0 %v3744_v5 }
   0xa   :  { %3749 = vmatprep.subr.bf16.mxu0 %v3748_v8 }
   0xb   :  { %7 = vsyncpa [#allocation3], 0  ;;  %v20_v18 = vld [vmem:[%s5499_s1 + $0x40] sm:$0xff]  ;;  %v21_v19 = vld [vmem:[%s5499_s1 + $0x48] sm:$0xff]  ;;  %v3776_v20 = vpack.c.bf16 %v31_v17, %v30_v14  ;;  %3773 = vmatprep.subr.bf16.mxu1 %v3772_v16  ;;  %s4378_s13 = smov 32   ;;  %vm205_vm0 = vcmask 261120  }
   0xc   :  { %3775 = vmatpush3.bf16.msra.mxu1 %v3772_v16  ;;  %v3756_v21 = vpack.c.bf16 %v21_v19, %v20_v18  ;;  %v22_v22 = vld [vmem:[%s5499_s1 + $0x50] sm:$0xff]  ;;  %v23_v23 = vld [vmem:[%s5499_s1 + $0x58] sm:$0xff]  ;;  %v24_v25 = vld [vmem:[%s5499_s1 + $0x60] sm:$0xff]  ;;  %s4379_s18 = smov 96   ;;  %s4380_s19 = smov 64   ;;  %vm520_vm2 = vcmask 523264  }
   0xd   :  { %3751 = vmatpush3.bf16.msra.mxu0 %v3748_v8  ;;  %3777 = vmatprep.subr.bf16.mxu1 %v3776_v20  ;;  %v3760_v24 = vpack.c.bf16 %v23_v23, %v22_v22  ;;  %v25_v26 = vld [vmem:[%s5499_s1 + $0x68] sm:$0xff]  ;;  %v26_v28 = vld [vmem:[%s5499_s1 + $0x70] sm:$0xff]  ;;  %v27_v29 = vld [vmem:[%s5499_s1 + $0x78] sm:$0xff]  ;;  %vm4382_vm3 = vmmov 0   ;;  %vm2635_vm4 = vcmask 254976   ;;  %vm2745_vm5 = vcmask 517120  }
   0xe   :  { %3753 = vmatprep.subr.bf16.mxu0 %v3752_v15  ;;  %v3764_v27 = vpack.c.bf16 %v25_v26, %v24_v25  ;;  %v3768_v30 = vpack.c.bf16 %v27_v29, %v26_v28  ;;  %v79_v31 = vld [vmem:[%s5498_s0 + $0x8] sm:$0xff]  ;;  %v80_v32 = vld [vmem:[%s5498_s0 + $0x10] sm:$0xff]  ;;  %v81_v33 = vld [vmem:[%s5498_s0 + $0x18] sm:$0xff]  ;;  %s4384_s12 = smov [#allocation2]  }
   0xf   :  { %v82_v34 = vld [vmem:[%s5498_s0 + $0x20] sm:$0xff]  ;;  %v83_v35 = vld [vmem:[%s5498_s0 + $0x28] sm:$0xff]  ;;  %v84_v36 = vld [vmem:[%s5498_s0 + $0x30] sm:$0xff] }
  0x10   :  { %3779 = vmatpush3.bf16.msra.mxu1 %v3776_v20  ;;  %v85_v37 = vld [vmem:[%s5498_s0 + $0x38] sm:$0xff]  ;;  %v4487_v38 = vld [vmem:[%s5499_s1 + $0x18f] ss:$0 sm:$0xff]  ;;  %v4492_v39 = vld [vmem:[%s5499_s1 + $0x190] ss:$0 sm:$0xff] }
  0x11   :  { %3755 = vmatpush3.bf16.msra.mxu0 %v3752_v15  ;;  %625 = vrot.lane.b32.xlu0 %v4487_v38, %s4378_s13  ;;  %v4501_v40 = vld [vmem:[%s5499_s1 + $0x18e] ss:$0 sm:$0xff]  ;;  %v2971_v50 = vld [vmem:[%s5499_s1 + $0x180] ss:$0 sm:$0xff]  ;;  %vm4608_vm1 = vmpackc.low %vm205_vm0, %vm205_vm0 }
  0x12   :  { %3757 = vmatprep.subr.bf16.mxu0 %v3756_v21  ;;  %1207 = vrot.lane.b32.xlu1 %v4492_v39, %s4378_s13 }
  0x15   :  { %3759 = vmatpush3.bf16.msra.mxu0 %v3756_v21  ;;  %340 = vrot.lane.b32.xlu0 %v4501_v40, %s4378_s13 }
  0x16   :  { %3761 = vmatprep.subr.bf16.mxu0 %v3760_v24 }
  0x19   :  { %3763 = vmatpush3.bf16.msra.mxu0 %v3760_v24 }
  0x1a   :  { %3765 = vmatprep.subr.bf16.mxu0 %v3764_v27 }
  0x1d   :  { %3767 = vmatpush3.bf16.msra.mxu0 %v3764_v27 }
  0x1e   :  { %3769 = vmatprep.subr.bf16.mxu0 %v3768_v30 }
  0x21   :  { %3771 = vmatpush3.bf16.msra.mxu0 %v3768_v30 }
  0x24   :  { %3364 = vmatmul.mubr.f32.vlgmr.msra.gmra.mrb[0].mxu0 %v79_v31 }
  0x25   :  { %3366 = vmatprep.mubr.f32.mxu0 %v80_v32 }
  0x28   :  { %3367 = vmatmul.mubr.f32.gmra.mrb[2].mxu0 %v81_v33 }
  0x29   :  { %3369 = vmatprep.mubr.f32.mxu0 %v82_v34 }
  0x2c   :  { %3370 = vmatmul.mubr.f32.gmra.mrb[4].mxu0 %v83_v35 }
  0x2d   :  { %3372 = vmatprep.mubr.f32.mxu0 %v84_v36 }
  0x30   :  { %3373 = vmatmul.mubr.f32.gmra.mrb[6].mxu0 %v85_v37 }
  0x83   :  { %v626_v49 = vpop.permute.xlu0 %625 }
  0x84   :  { %v1208_v17 = vpop.permute.xlu1 %1207 }
  0x87   :  { %v341_v55 = vpop.permute.xlu0 %340 }
  0xf7   :  { %v4505_v41 = vpop.f32.mrb[0].mxu0 }
  0xf8   :  { %5509 = vst [vmem:[#allocation5_spill] sm:$0xff] %v4505_v41  ;;  %v4507_v42 = vpop.f32.mrb[1].mxu0 }
  0xf9   :  { %5510 = vst [vmem:[#allocation6_spill] sm:$0xff] %v4507_v42  ;;  %3383 = vmatprep.mubr.msk.f32.mxu1 %vm205_vm0, %v4507_v42 }
  0xfa   :  { %3384 = vmatmul.mubr.msk.f32.vlgmr.msra.gmra.mrb[0].mxu1 %vm205_vm0, %v4505_v41 }
  0xfb   :  { %v4513_v43 = vpop.f32.mrb[2].mxu0 }
  0xfc   :  { %5511 = vst [vmem:[#allocation7_spill] sm:$0xff] %v4513_v43  ;;  %v4515_v44 = vpop.f32.mrb[3].mxu0 }
  0xfd   :  { %5512 = vst [vmem:[#allocation8_spill] sm:$0xff] %v4515_v44  ;;  %3386 = vmatprep.mubr.msk.f32.mxu1 %vm205_vm0, %v4515_v44 }
  0xfe   :  { %3387 = vmatmul.mubr.msk.f32.gmra.mrb[2].mxu1 %vm205_vm0, %v4513_v43 }
  0xff   :  { %v4521_v45 = vpop.f32.mrb[4].mxu0 }
 0x100   :  { %5513 = vst [vmem:[#allocation9_spill] sm:$0xff] %v4521_v45  ;;  %v4523_v46 = vpop.f32.mrb[5].mxu0 }
 0x101   :  { %5514 = vst [vmem:[#allocation10_spill] sm:$0xff] %v4523_v46  ;;  %3389 = vmatprep.mubr.msk.f32.mxu1 %vm205_vm0, %v4523_v46 }
 0x102   :  { %3390 = vmatmul.mubr.msk.f32.gmra.mrb[4].mxu1 %vm205_vm0, %v4521_v45 }
 0x103   :  { %v4529_v47 = vpop.f32.mrb[6].mxu0 }
 0x104   :  { %5515 = vst [vmem:[#allocation11_spill] sm:$0xff] %v4529_v47  ;;  %v4531_v48 = vpop.f32.mrb[7].mxu0 }
 0x105   :  { %5516 = vst [vmem:[#allocation12_spill] sm:$0xff] %v4531_v48  ;;  %3392 = vmatprep.mubr.msk.f32.mxu1 %vm205_vm0, %v4531_v48 }
 0x106   :  { %3393 = vmatmul.mubr.msk.f32.gmra.mrb[6].mxu1 %vm205_vm0, %v4529_v47 }
 0x1cd   :  { %v3385_v51 = vpop.f32.mrb[0].mxu1 }
 0x1ce   :  { %v4540_v52 = vadd.f32 %v3385_v51, %v2971_v50  ;;  %v296_v53 = vpop.f32.mrb[1].mxu1 }
 0x1cf   :  { %v4542_v54 = vadd.f32 %v2971_v50, %v296_v53  ;;  %v3055_v53 = vld [vmem:[%s5499_s1 + $0x191] ss:$0 sm:$0xff] }
 0x1d0   :  { %v629_v56 = vmul.f32 %v626_v49, %v4540_v52  ;;  %v344_v0 = vmul.f32 %v341_v55, %v4540_v52  ;;  %v1211_v25 = vmul.f32 %v1208_v17, %v4540_v52 }
 0x1d1   :  { %v3388_v57 = vpop.f32.mrb[2].mxu1  ;;  %3411 = vmatprep.mubr.msk.f32.mxu1 %vm205_vm0, %v4542_v54  ;;  %3439 = vmatprep.mubr.msk.f32.mxu0 %vm205_vm0, %v4542_v54  ;;  %v628_v58 = vmul.f32 %v626_v49, %v4542_v54  ;;  %v343_v63 = vmul.f32 %v341_v55, %v4542_v54  ;;  %v1210_v24 = vmul.f32 %v1208_v17, %v4542_v54 }
 0x1d2   :  { %v4550_v59 = vadd.f32 %v3388_v57, %v2971_v50  ;;  %v306_v60 = vpop.f32.mrb[3].mxu1 }
 0x1d3   :  { %v4552_v61 = vadd.f32 %v2971_v50, %v306_v60  ;;  %v4039_v62 = vpack.i.bf16 %v629_v56, %v628_v58  ;;  %v4049_v9 = vpack.i.bf16 %v344_v0, %v343_v63  ;;  %v4074_v30 = vpack.i.bf16 %v1211_v25, %v1210_v24 }
 0x1d4   :  { %v631_v1 = vmul.f32 %v626_v49, %v4550_v59  ;;  %v346_v7 = vmul.f32 %v341_v55, %v4550_v59  ;;  %v1213_v31 = vmul.f32 %v1208_v17, %v4550_v59 }
 0x1d5   :  { %4040 = vrot.lane.b32.xlu1 %v4039_v62, %s4379_s18  ;;  %v3391_v2 = vpop.f32.mrb[4].mxu1  ;;  %v630_v3 = vmul.f32 %v626_v49, %v4552_v61  ;;  %v345_v6 = vmul.f32 %v341_v55, %v4552_v61  ;;  %v1212_v33 = vmul.f32 %v1208_v17, %v4552_v61 }
 0x1d6   :  { %v4559_v4 = vadd.f32 %v3391_v2, %v2971_v50  ;;  %v316_v5 = vpop.f32.mrb[5].mxu1 }
 0x1d7   :  { %v4563_v8 = vadd.f32 %v2971_v50, %v316_v5  ;;  %v4044_v10 = vpack.i.bf16 %v631_v1, %v630_v3  ;;  %v4059_v16 = vpack.i.bf16 %v346_v7, %v345_v6 }
 0x1d8   :  { %v633_v11 = vmul.f32 %v626_v49, %v4559_v4  ;;  %v348_v21 = vmul.f32 %v341_v55, %v4559_v4  ;;  %v1215_v35 = vmul.f32 %v1208_v17, %v4559_v4 }
 0x1d9   :  { %4050 = vrot.lane.b32.xlu1 %v4049_v9, %s4379_s18  ;;  %4045 = vrot.lane.b32.xlu0 %v4044_v10, %s4379_s18  ;;  %v3394_v12 = vpop.f32.mrb[6].mxu1  ;;  %v632_v13 = vmul.f32 %v626_v49, %v4563_v8  ;;  %v347_v20 = vmul.f32 %v341_v55, %v4563_v8  ;;  %v1214_v34 = vmul.f32 %v1208_v17, %v4563_v8 }
 0x1da   :  { %v4569_v14 = vadd.f32 %v3394_v12, %v2971_v50  ;;  %v326_v15 = vpop.f32.mrb[7].mxu1 }
 0x1db   :  { %v4571_v18 = vadd.f32 %v2971_v50, %v326_v15  ;;  %v4054_v19 = vpack.i.bf16 %v633_v11, %v632_v13  ;;  %v4069_v26 = vpack.i.bf16 %v348_v21, %v347_v20  ;;  %v4089_v50 = vpack.i.bf16 %v1215_v35, %v1214_v34 }
 0x1dc   :  { %v635_v22 = vmul.f32 %v626_v49, %v4569_v14  ;;  %v350_v29 = vmul.f32 %v341_v55, %v4569_v14  ;;  %v1217_v37 = vmul.f32 %v1208_v17, %v4569_v14 }
 0x1dd   :  { %4060 = vrot.lane.b32.xlu1 %v4059_v16, %s4379_s18  ;;  %4055 = vrot.lane.b32.xlu0 %v4054_v19, %s4379_s18  ;;  %v634_v23 = vmul.f32 %v626_v49, %v4571_v18  ;;  %v349_v28 = vmul.f32 %v341_v55, %v4571_v18  ;;  %v1216_v36 = vmul.f32 %v1208_v17, %v4571_v18 }
 0x1de   :  { %v4084_v49 = vpack.i.bf16 %v1213_v31, %v1212_v33 }
 0x1df   :  { %v4064_v27 = vpack.i.bf16 %v635_v22, %v634_v23  ;;  %v4079_v32 = vpack.i.bf16 %v350_v29, %v349_v28  ;;  %v4094_v51 = vpack.i.bf16 %v1217_v37, %v1216_v36 }
 0x1e1   :  { %4070 = vrot.lane.b32.xlu1 %v4069_v26, %s4379_s18  ;;  %4065 = vrot.lane.b32.xlu0 %v4064_v27, %s4379_s18 }
 0x1e5   :  { %4075 = vrot.lane.b32.xlu0 %v4074_v30, %s4379_s18  ;;  %4080 = vrot.lane.b32.xlu1 %v4079_v32, %s4379_s18 }
 0x1e9   :  { %4085 = vrot.lane.b32.xlu0 %v4084_v49, %s4379_s18  ;;  %4090 = vrot.lane.b32.xlu1 %v4089_v50, %s4379_s18 }
 0x1ed   :  { %4095 = vrot.lane.b32.xlu0 %v4094_v51, %s4379_s18  ;;  %609 = vrot.lane.b32.xlu1 %v4501_v40, %s4380_s19 }
 0x1f1   :  { %869 = vrot.lane.b32.xlu0 %v4487_v38, %s4380_s19  ;;  %1636 = vrot.lane.b32.xlu1 %v3055_v53, %s4378_s13  ;;  %s2963_s13 = sshll.u32 %s4384_s12, 4  ;;  %s2964_s13 = int_to_ptr.vmem [resolvable:$true] %s2963_s13 }
 0x1f2   :  { %s4354_s14 = scalar_lea.vmem %s2964_s13, 32  ;;  %p4359_p1 = scmp.lt.s32.totalorder %s2964_s13, %s2964_s13 }
 0x1f3   :  { %p4355_p0 = scmp.ne.s32.totalorder %s2964_s13, %s4354_s14  ;;  %p4360_p2 = scmp.lt.s32.totalorder %s4354_s14, %s4354_s14 }
 0x1f5   :  { %1451 = vrot.lane.b32.xlu0 %v4492_v39, %s4380_s19  ;;  %p4361_p3 = por %p4360_p2, %p4359_p1 }
 0x1f7   :  { %p4362_p4 = pnand %p4361_p3, %p4355_p0 }
 0x247   :  { %v4041_v55 = vpop.permute.xlu1 %4040 }
 0x248   :  { %v4043_v56 = vunpack.i.h.bf16 %v4041_v55  ;;  %v4042_v57 = vunpack.i.l.bf16 %v4041_v55 }
 0x24a   :  { %v3804_v40 = vpack.c.bf16 %v4043_v56, %v4042_v57 }
 0x24b   :  { %v4051_v60 = vpop.permute.xlu1 %4050  ;;  %v4046_v62 = vpop.permute.xlu0 %4045 }
 0x24c   :  { %v4053_v63 = vunpack.i.h.bf16 %v4051_v60  ;;  %v4052_v0 = vunpack.i.l.bf16 %v4051_v60  ;;  %v4048_v38 = vunpack.i.h.bf16 %v4046_v62  ;;  %v4047_v1 = vunpack.i.l.bf16 %v4046_v62  ;;  %3806 = vmatprep.subr.msk.bf16.mxu0 %vm4608_vm1, %v3804_v40 }
 0x24d   :  { %3809 = vmatpush3.bf16.xpose.msk.msra.mxu0 %vm4608_vm1, %v3804_v40 }
 0x24e   :  { %v3780_v39 = vpack.c.bf16 %v4053_v63, %v4052_v0  ;;  %v3810_v2 = vpack.c.bf16 %v4048_v38, %v4047_v1 }
 0x24f   :  { %v4061_v3 = vpop.permute.xlu1 %4060  ;;  %v4056_v5 = vpop.permute.xlu0 %4055 }
 0x250   :  { %v4063_v6 = vunpack.i.h.bf16 %v4061_v3  ;;  %v4062_v7 = vunpack.i.l.bf16 %v4061_v3  ;;  %v4058_v9 = vunpack.i.h.bf16 %v4056_v5  ;;  %v4057_v10 = vunpack.i.l.bf16 %v4056_v5  ;;  %3782 = vmatprep.subr.msk.bf16.mxu1 %vm4608_vm1, %v3780_v39  ;;  %3812 = vmatprep.subr.msk.bf16.mxu0 %vm4608_vm1, %v3810_v2 }
 0x251   :  { %3785 = vmatpush3.bf16.xpose.msk.msra.mxu1 %vm4608_vm1, %v3780_v39 }
 0x252   :  { %v3786_v11 = vpack.c.bf16 %v4063_v6, %v4062_v7  ;;  %v3816_v15 = vpack.c.bf16 %v4058_v9, %v4057_v10 }
 0x253   :  { %v4071_v12 = vpop.permute.xlu1 %4070  ;;  %v4066_v13 = vpop.permute.xlu0 %4065 }
 0x254   :  { %v4073_v16 = vunpack.i.h.bf16 %v4071_v12  ;;  %v4072_v17 = vunpack.i.l.bf16 %v4071_v12  ;;  %3788 = vmatprep.subr.msk.bf16.mxu1 %vm4608_vm1, %v3786_v11  ;;  %v4068_v21 = vunpack.i.h.bf16 %v4066_v13  ;;  %v4067_v22 = vunpack.i.l.bf16 %v4066_v13 }
 0x255   :  { %3815 = vmatpush3.bf16.xpose.msk.msra.mxu0 %vm4608_vm1, %v3810_v2 }
 0x256   :  { %3818 = vmatprep.subr.msk.bf16.mxu0 %vm4608_vm1, %v3816_v15  ;;  %v3792_v20 = vpack.c.bf16 %v4073_v16, %v4072_v17  ;;  %v3822_v25 = vpack.c.bf16 %v4068_v21, %v4067_v22 }
 0x257   :  { %v4076_v19 = vpop.permute.xlu0 %4075  ;;  %v4081_v23 = vpop.permute.xlu1 %4080 }
 0x258   :  { %v4083_v26 = vunpack.i.h.bf16 %v4081_v23  ;;  %v4082_v27 = vunpack.i.l.bf16 %v4081_v23  ;;  %v4078_v29 = vunpack.i.h.bf16 %v4076_v19  ;;  %v4077_v30 = vunpack.i.l.bf16 %v4076_v19 }
 0x259   :  { %3791 = vmatpush3.bf16.xpose.msk.msra.mxu1 %vm4608_vm1, %v3786_v11 }
 0x25a   :  { %3794 = vmatprep.subr.msk.bf16.mxu1 %vm4608_vm1, %v3792_v20  ;;  %v3798_v32 = vpack.c.bf16 %v4083_v26, %v4082_v27  ;;  %v3860_v33 = vpack.c.bf16 %v4078_v29, %v4077_v30 }
 0x25b   :  { %v4086_v24 = vpop.permute.xlu0 %4085  ;;  %v4091_v28 = vpop.permute.xlu1 %4090 }
 0x25c   :  { %v4088_v60 = vunpack.i.h.bf16 %v4086_v24  ;;  %v4087_v62 = vunpack.i.l.bf16 %v4086_v24  ;;  %v4093_v10 = vunpack.i.h.bf16 %v4091_v28  ;;  %v4092_v11 = vunpack.i.l.bf16 %v4091_v28 }
 0x25d   :  { %3821 = vmatpush3.bf16.xpose.msk.msra.mxu0 %vm4608_vm1, %v3816_v15 }
 0x25e   :  { %3824 = vmatprep.subr.msk.bf16.mxu0 %vm4608_vm1, %v3822_v25  ;;  %v3866_v3 = vpack.c.bf16 %v4088_v60, %v4087_v62  ;;  %v3872_v16 = vpack.c.bf16 %v4093_v10, %v4092_v11 }
 0x25f   :  { %v4636_v31 = vpop.permute.xlu0 %4095  ;;  %v610_v35 = vpop.permute.xlu1 %609 }
 0x260   :  { %v612_v57 = vmul.f32 %v610_v35, %v4542_v54  ;;  %v613_v40 = vmul.f32 %v610_v35, %v4540_v52  ;;  %v614_v0 = vmul.f32 %v610_v35, %v4552_v61  ;;  %v615_v38 = vmul.f32 %v610_v35, %v4550_v59 }
 0x261   :  { %3797 = vmatpush3.bf16.xpose.msk.msra.mxu1 %vm4608_vm1, %v3792_v20  ;;  %v616_v39 = vmul.f32 %v610_v35, %v4563_v8  ;;  %v617_v2 = vmul.f32 %v610_v35, %v4559_v4  ;;  %v618_v13 = vmul.f32 %v610_v35, %v4571_v18  ;;  %v619_v15 = vmul.f32 %v610_v35, %v4569_v14 }
 0x262   :  { %3800 = vmatprep.subr.msk.bf16.mxu1 %vm4608_vm1, %v3798_v32  ;;  %v4114_v1 = vpack.i.bf16 %v613_v40, %v612_v57  ;;  %v4119_v5 = vpack.i.bf16 %v615_v38, %v614_v0  ;;  %v4098_v19 = vunpack.i.h.bf16 %v4636_v31  ;;  %v4097_v20 = vunpack.i.l.bf16 %v4636_v31  ;;  %v4744_v40 = vld [vmem:[%s5498_s0 + $0x48] sm:$0xff] }
 0x263   :  { %v870_v34 = vpop.permute.xlu0 %869  ;;  %v4124_v6 = vpack.i.bf16 %v617_v2, %v616_v39  ;;  %v4134_v17 = vpack.i.bf16 %v619_v15, %v618_v13  ;;  %v4732_v22 = vpop.permute.xlu1 %1636 }
 0x264   :  { %v872_v36 = vmul.f32 %v870_v34, %v4542_v54  ;;  %v873_v37 = vmul.f32 %v870_v34, %v4540_v52  ;;  %v874_v49 = vmul.f32 %v870_v34, %v4552_v61  ;;  %v875_v50 = vmul.f32 %v870_v34, %v4550_v59 }
 0x265   :  { %3827 = vmatpush3.bf16.xpose.msk.msra.mxu0 %vm4608_vm1, %v3822_v25  ;;  %v876_v55 = vmul.f32 %v870_v34, %v4563_v8  ;;  %v877_v56 = vmul.f32 %v870_v34, %v4559_v4  ;;  %v878_v7 = vmul.f32 %v870_v34, %v4571_v18  ;;  %v879_v9 = vmul.f32 %v870_v34, %v4569_v14 }
 0x266   :  { %3862 = vmatprep.subr.msk.bf16.mxu0 %vm4608_vm1, %v3860_v33  ;;  %v4099_v51 = vpack.i.bf16 %v873_v37, %v872_v36  ;;  %v4104_v53 = vpack.i.bf16 %v875_v50, %v874_v49  ;;  %v3878_v21 = vpack.c.bf16 %v4098_v19, %v4097_v20 }
 0x267   :  { %v4109_v63 = vpack.i.bf16 %v877_v56, %v876_v55  ;;  %v4129_v12 = vpack.i.bf16 %v879_v9, %v878_v7  ;;  %v4734_v23 = vpop.permute.xlu0 %1451 }
 0x268   :  { %4100 = vrot.lane.b32.xlu0 %v4099_v51, %s4380_s19  ;;  %4105 = vrot.lane.b32.xlu1 %v4104_v53, %s4380_s19 }
 0x269   :  { %3803 = vmatpush3.bf16.xpose.msk.msra.mxu1 %vm4608_vm1, %v3798_v32 }
 0x26c   :  { %4110 = vrot.lane.b32.xlu0 %v4109_v63, %s4380_s19  ;;  %3440 = vmatmul.mubr.msk.f32.vlgmr.msra.gmra.mrb[8].mxu0 %vm205_vm0, %v4540_v52 }
 0x26d   :  { %4115 = vrot.lane.b32.xlu1 %v4114_v1, %s4380_s19  ;;  %3442 = vmatprep.mubr.msk.f32.mxu0 %vm205_vm0, %v4552_v61  ;;  %v4754_v1 = vld [vmem:[%s5498_s0 + $0x40] sm:$0xff] }
 0x26e   :  { %3865 = vmatpush3.bf16.xpose.msk.msra.mxu0 %vm4608_vm1, %v3860_v33 }
 0x26f   :  { %3868 = vmatprep.subr.msk.bf16.mxu0 %vm4608_vm1, %v3866_v3 }
 0x270   :  { %3443 = vmatmul.mubr.msk.f32.gmra.mrb[10].mxu0 %vm205_vm0, %v4550_v59  ;;  %4120 = vrot.lane.b32.xlu0 %v4119_v5, %s4380_s19 }
 0x271   :  { %4125 = vrot.lane.b32.xlu1 %v4124_v6, %s4380_s19  ;;  %3412 = vmatmul.mubr.msk.f32.vlgmr.msra.gmra.mrb[8].mxu1 %vm205_vm0, %v4540_v52  ;;  %v4762_v6 = vld [vmem:[%s5498_s0 + $0x50] sm:$0xff] }
 0x272   :  { %3414 = vmatprep.mubr.msk.f32.mxu1 %vm205_vm0, %v4552_v61  ;;  %3445 = vmatprep.mubr.msk.f32.mxu0 %vm205_vm0, %v4563_v8 }
 0x274   :  { %3446 = vmatmul.mubr.msk.f32.gmra.mrb[12].mxu0 %vm205_vm0, %v4559_v4 }
 0x275   :  { %4130 = vrot.lane.b32.xlu1 %v4129_v12, %s4380_s19  ;;  %3415 = vmatmul.mubr.msk.f32.gmra.mrb[10].mxu1 %vm205_vm0, %v4550_v59  ;;  %v4775_v12 = vld [vmem:[%s5498_s0 + $0x58] sm:$0xff] }
 0x276   :  { %3417 = vmatprep.mubr.msk.f32.mxu1 %vm205_vm0, %v4563_v8  ;;  %3448 = vmatprep.mubr.msk.f32.mxu0 %vm205_vm0, %v4571_v18 }
 0x277   :  { %3871 = vmatpush3.bf16.xpose.msk.msra.mxu0 %vm4608_vm1, %v3866_v3 }
 0x278   :  { %3874 = vmatprep.subr.msk.bf16.mxu0 %vm4608_vm1, %v3872_v16  ;;  %3449 = vmatmul.mubr.msk.f32.gmra.mrb[14].mxu0 %vm205_vm0, %v4569_v14 }
 0x279   :  { %4135 = vrot.lane.b32.xlu1 %v4134_v17, %s4380_s19  ;;  %3418 = vmatmul.mubr.msk.f32.gmra.mrb[12].mxu1 %vm205_vm0, %v4559_v4 }
 0x27a   :  { %3420 = vmatprep.mubr.msk.f32.mxu1 %vm205_vm0, %v4571_v18  ;;  %3523 = vmatprep.mubr.msk.f32.mxu0 %vm205_vm0, %v4542_v54 }
 0x27d   :  { %3421 = vmatmul.mubr.msk.f32.gmra.mrb[14].mxu1 %vm205_vm0, %v4569_v14 }
 0x27f   :  { %3877 = vmatpush3.bf16.xpose.msk.msra.mxu0 %vm4608_vm1, %v3872_v16 }
 0x280   :  { %3880 = vmatprep.subr.msk.bf16.mxu0 %vm4608_vm1, %v3878_v21 }
 0x287   :  { %3883 = vmatpush3.bf16.xpose.msk.msra.mxu0 %vm4608_vm1, %v3878_v21 }
 0x28e   :  { %3524 = vmatmul.mubr.msk.f32.vlgmr.msra.gmra.mrb[16].mxu0 %vm205_vm0, %v4540_v52 }
 0x28f   :  { %3526 = vmatprep.mubr.msk.f32.mxu0 %vm205_vm0, %v4552_v61 }
 0x292   :  { %3527 = vmatmul.mubr.msk.f32.gmra.mrb[18].mxu0 %vm205_vm0, %v4550_v59 }
 0x293   :  { %3529 = vmatprep.mubr.msk.f32.mxu0 %vm205_vm0, %v4563_v8 }
 0x296   :  { %3530 = vmatmul.mubr.msk.f32.gmra.mrb[20].mxu0 %vm205_vm0, %v4559_v4 }
 0x297   :  { %3532 = vmatprep.mubr.msk.f32.mxu0 %vm205_vm0, %v4571_v18 }
 0x29a   :  { %3533 = vmatmul.mubr.msk.f32.gmra.mrb[22].mxu0 %vm205_vm0, %v4569_v14 }
 0x2da   :  { %v4101_v24 = vpop.permute.xlu0 %4100  ;;  %v4106_v25 = vpop.permute.xlu1 %4105 }
 0x2db   :  { %v4103_v26 = vunpack.i.h.bf16 %v4101_v24  ;;  %v4102_v27 = vunpack.i.l.bf16 %v4101_v24  ;;  %v4108_v28 = vunpack.i.h.bf16 %v4106_v25  ;;  %v4107_v29 = vunpack.i.l.bf16 %v4106_v25 }
 0x2dd   :  { %v3828_v30 = vpack.c.bf16 %v4103_v26, %v4102_v27  ;;  %v3832_v35 = vpack.c.bf16 %v4108_v28, %v4107_v29  ;;  %v4795_v29 = vld [vmem:[%s5498_s0 + $0x60] sm:$0xff] }
 0x2de   :  { %v4111_v31 = vpop.permute.xlu0 %4110 }
 0x2df   :  { %v4113_v32 = vunpack.i.h.bf16 %v4111_v31  ;;  %v4112_v33 = vunpack.i.l.bf16 %v4111_v31  ;;  %v4116_v34 = vpop.permute.xlu1 %4115  ;;  %3829 = vmatprep.subr.bf16.mxu1 %v3828_v30 }
 0x2e0   :  { %3831 = vmatpush3.bf16.msra.mxu1 %v3828_v30  ;;  %v4118_v50 = vunpack.i.h.bf16 %v4116_v34  ;;  %v4117_v51 = vunpack.i.l.bf16 %v4116_v34 }
 0x2e1   :  { %3833 = vmatprep.subr.bf16.mxu1 %v3832_v35  ;;  %v3836_v37 = vpack.c.bf16 %v4113_v32, %v4112_v33  ;;  %v4805_v33 = vld [vmem:[%s5498_s0 + $0x68] sm:$0xff] }
 0x2e2   :  { %v4738_v57 = vpack.c.bf16 %v4118_v50, %v4117_v51 }
 0x2e3   :  { %v4736_v36 = vpop.permute.xlu1 %4125 }
 0x2e4   :  { %3835 = vmatpush3.bf16.msra.mxu1 %v3832_v35 }
 0x2e5   :  { %3837 = vmatprep.subr.bf16.mxu1 %v3836_v37 }
 0x2e7   :  { %v4131_v49 = vpop.permute.xlu1 %4130 }
 0x2e8   :  { %v4133_v53 = vunpack.i.h.bf16 %v4131_v49  ;;  %v4132_v55 = vunpack.i.l.bf16 %v4131_v49  ;;  %3839 = vmatpush3.bf16.msra.mxu1 %v3836_v37 }
 0x2ea   :  { %v3840_v56 = vpack.c.bf16 %v4133_v53, %v4132_v55 }
 0x2ec   :  { %3841 = vmatprep.subr.bf16.mxu1 %v3840_v56 }
 0x2ed   :  { %3843 = vmatpush3.bf16.msra.mxu1 %v3840_v56  ;;  %v4825_v56 = vld [vmem:[%s5498_s0 + $0x70] sm:$0xff] }
 0x2ee   :  { %3845 = vmatprep.subr.bf16.mxu1 %v4738_v57 }
 0x33f   :  { %v3441_v60 = vpop.f32.mrb[8].mxu0 }
 0x340   :  { %v4747_v62 = vadd.f32 %v3441_v60, %v4744_v40  ;;  %v742_v63 = vpop.f32.mrb[9].mxu0 }
 0x341   :  { %v4768_v9 = vadd.f32 %v742_v63, %v4754_v1 }
 0x342   :  { %v784_v0 = vsel %vm520_vm2, %v4747_v62, -inf }
 0x343   :  { %v3444_v38 = vpop.f32.mrb[10].mxu0  ;;  %785 = vmax.xlane.f32.xlu0 %v784_v0  ;;  %v781_v24 = vsel %vm520_vm2, %v4768_v9, -inf  ;;  %v4835_v0 = vld [vmem:[%s5498_s0 + $0x78] sm:$0xff] }
 0x344   :  { %v3413_v39 = vpop.f32.mrb[8].mxu1  ;;  %v752_v2 = vpop.f32.mrb[11].mxu0  ;;  %v4783_v20 = vadd.f32 %v3444_v38, %v4775_v12 }
 0x345   :  { %v4757_v3 = vadd.f32 %v3413_v39, %v4744_v40  ;;  %v481_v5 = vpop.f32.mrb[9].mxu1  ;;  %v4778_v13 = vadd.f32 %v752_v2, %v4762_v6 }
 0x346   :  { %v4765_v7 = vadd.f32 %v481_v5, %v4754_v1  ;;  %v790_v32 = vsel %vm520_vm2, %v4783_v20, -inf }
 0x347   :  { %v3447_v10 = vpop.f32.mrb[12].mxu0  ;;  %v524_v11 = vsel %vm520_vm2, %v4757_v3, -inf  ;;  %v787_v28 = vsel %vm520_vm2, %v4778_v13, -inf }
 0x348   :  { %525 = vmax.xlane.f32.xlu1 %v524_v11  ;;  %v3416_v15 = vpop.f32.mrb[10].mxu1  ;;  %v762_v16 = vpop.f32.mrb[13].mxu0  ;;  %v521_v17 = vsel %vm520_vm2, %v4765_v7, -inf  ;;  %v4813_v50 = vadd.f32 %v3447_v10, %v4805_v33 }
 0x349   :  { %v491_v19 = vpop.f32.mrb[11].mxu1  ;;  %522 = vmax.xlane.f32.xlu0 %v521_v17  ;;  %v4798_v31 = vadd.f32 %v3416_v15, %v4775_v12  ;;  %v4808_v34 = vadd.f32 %v762_v16, %v4795_v29 }
 0x34a   :  { %v4788_v25 = vadd.f32 %v491_v19, %v4762_v6  ;;  %v796_v63 = vsel %vm520_vm2, %v4813_v50, -inf }
 0x34b   :  { %v3450_v21 = vpop.f32.mrb[14].mxu0  ;;  %v530_v51 = vsel %vm520_vm2, %v4798_v31, -inf  ;;  %v793_v55 = vsel %vm520_vm2, %v4808_v34, -inf }
 0x34c   :  { %782 = vmax.xlane.f32.xlu1 %v781_v24  ;;  %v3419_v26 = vpop.f32.mrb[12].mxu1  ;;  %v772_v27 = vpop.f32.mrb[15].mxu0  ;;  %v527_v37 = vsel %vm520_vm2, %v4788_v25, -inf  ;;  %v4843_v2 = vadd.f32 %v3450_v21, %v4835_v0 }
 0x34d   :  { %v501_v30 = vpop.f32.mrb[13].mxu1  ;;  %788 = vmax.xlane.f32.xlu0 %v787_v28  ;;  %v4828_v60 = vadd.f32 %v3419_v26, %v4805_v33  ;;  %v4838_v38 = vadd.f32 %v772_v27, %v4825_v56 }
 0x34e   :  { %v4818_v53 = vadd.f32 %v501_v30, %v4795_v29  ;;  %v802_v15 = vsel %vm520_vm2, %v4843_v2, -inf }
 0x34f   :  { %v536_v5 = vsel %vm520_vm2, %v4828_v60, -inf  ;;  %v799_v10 = vsel %vm520_vm2, %v4838_v38, -inf }
 0x350   :  { %791 = vmax.xlane.f32.xlu1 %v790_v32  ;;  %v3422_v35 = vpop.f32.mrb[14].mxu1  ;;  %v533_v39 = vsel %vm520_vm2, %v4818_v53, -inf }
 0x351   :  { %v511_v49 = vpop.f32.mrb[15].mxu1  ;;  %528 = vmax.xlane.f32.xlu0 %v527_v37  ;;  %v4850_v11 = vadd.f32 %v3422_v35, %v4835_v0 }
 0x353   :  { %v542_v21 = vsel %vm520_vm2, %v4850_v11, -inf }
 0x354   :  { %531 = vmax.xlane.f32.xlu1 %v530_v51 }
 0x355   :  { %794 = vmax.xlane.f32.xlu0 %v793_v55  ;;  %v1454_v55 = vmul.f32 %v4734_v23, %v4542_v54 }
 0x358   :  { %797 = vmax.xlane.f32.xlu1 %v796_v63  ;;  %v1455_v63 = vmul.f32 %v4734_v23, %v4540_v52 }
 0x359   :  { %534 = vmax.xlane.f32.xlu0 %v533_v39 }
 0x35c   :  { %537 = vmax.xlane.f32.xlu1 %v536_v5 }
 0x35d   :  { %800 = vmax.xlane.f32.xlu0 %v799_v10 }
 0x360   :  { %803 = vmax.xlane.f32.xlu1 %v802_v15  ;;  %v4139_v15 = vpack.i.bf16 %v1455_v63, %v1454_v55  ;;  %v4906_v63 = vpop.permute.xlu0 %4120 }
 0x361   :  { %v3525_v16 = vpop.f32.mrb[16].mxu0 }
 0x362   :  { %v1324_v17 = vpop.f32.mrb[17].mxu0  ;;  %v4855_v19 = vadd.f32 %v3525_v16, %v4744_v40 }
 0x363   :  { %v4860_v27 = vadd.f32 %v1324_v17, %v4754_v1  ;;  %v4882_v17 = vadd.f32 %v511_v49, %v4825_v56 }
 0x364   :  { %543 = vmax.xlane.f32.xlu1 %v542_v21  ;;  %v1366_v28 = vsel %vm520_vm2, %v4855_v19, -inf }
 0x365   :  { %v3528_v24 = vpop.f32.mrb[18].mxu0  ;;  %v1363_v37 = vsel %vm520_vm2, %v4860_v27, -inf }
 0x366   :  { %v1334_v26 = vpop.f32.mrb[19].mxu0  ;;  %v4865_v35 = vadd.f32 %v3528_v24, %v4775_v12  ;;  %v539_v24 = vsel %vm520_vm2, %v4882_v17, -inf }
 0x367   :  { %v4885_v21 = vadd.f32 %v1334_v26, %v4762_v6 }
 0x368   :  { %1367 = vmax.xlane.f32.xlu1 %v1366_v28  ;;  %v1372_v10 = vsel %vm520_vm2, %v4865_v35, -inf }
 0x369   :  { %v3531_v30 = vpop.f32.mrb[20].mxu0 }
 0x36a   :  { %v1344_v32 = vpop.f32.mrb[21].mxu0  ;;  %v4890_v28 = vadd.f32 %v3531_v30, %v4805_v33 }
 0x36c   :  { %1364 = vmax.xlane.f32.xlu1 %v1363_v37  ;;  %v1369_v37 = vsel %vm520_vm2, %v4885_v21, -inf  ;;  %v1378_v49 = vsel %vm520_vm2, %v4890_v28, -inf }
 0x36d   :  { %v3534_v51 = vpop.f32.mrb[22].mxu0 }
 0x36e   :  { %v1354_v39 = vpop.f32.mrb[23].mxu0  ;;  %v4874_v5 = vadd.f32 %v3534_v51, %v4835_v0  ;;  %v4895_v51 = vadd.f32 %v1344_v32, %v4795_v29  ;;  %v4908_v32 = vpop.permute.xlu1 %4135 }
 0x36f   :  { %v4900_v26 = vadd.f32 %v1354_v39, %v4825_v56 }
 0x370   :  { %1373 = vmax.xlane.f32.xlu1 %v1372_v10  ;;  %v1384_v16 = vsel %vm520_vm2, %v4874_v5, -inf  ;;  %v1375_v55 = vsel %vm520_vm2, %v4895_v51, -inf }
 0x371   :  { %v1381_v30 = vsel %vm520_vm2, %v4900_v26, -inf }
 0x373   :  { %4140 = vrot.lane.b32.xlu0 %v4139_v15, %s4380_s19 }
 0x374   :  { %1385 = vmax.xlane.f32.xlu1 %v1384_v16 }
 0x392   :  { %540 = vmax.xlane.f32.xlu0 %v539_v24 }
 0x396   :  { %1370 = vmax.xlane.f32.xlu0 %v1369_v37 }
 0x39a   :  { %1379 = vmax.xlane.f32.xlu0 %v1378_v49 }
 0x39e   :  { %1376 = vmax.xlane.f32.xlu0 %v1375_v55 }
 0x3a2   :  { %1382 = vmax.xlane.f32.xlu0 %v1381_v30 }
 0x3d0   :  { %v786_v10 = vpop.xlane.xlu0 %785 }
 0x3d1   :  { %v806_v15 = vsub.f32 %v4747_v62, %v786_v10 }
 0x3d3   :  { %v815_v16 = vmul.f32 1.442695, %v806_v15 }
 0x3d5   :  { %4199 = vpow2.f32 %v815_v16  ;;  %v526_v24 = vpop.xlane.xlu1 %525 }
 0x3d6   :  { %v546_v39 = vsub.f32 %v4757_v3, %v526_v24  ;;  %v523_v37 = vpop.xlane.xlu0 %522 }
 0x3d7   :  { %v545_v49 = vsub.f32 %v4765_v7, %v523_v37 }
 0x3d8   :  { %v555_v55 = vmul.f32 1.442695, %v546_v39 }
 0x3d9   :  { %v553_v48 = vmul.f32 1.442695, %v545_v49  ;;  %v783_v47 = vpop.xlane.xlu1 %782 }
 0x3da   :  { %4201 = vpow2.f32 %v555_v55  ;;  %v805_v30 = vsub.f32 %v4768_v9, %v783_v47  ;;  %v789_v46 = vpop.xlane.xlu0 %788 }
 0x3db   :  { %4203 = vpow2.f32 %v553_v48  ;;  %v807_v45 = vsub.f32 %v4778_v13, %v789_v46 }
 0x3dc   :  { %v813_v44 = vmul.f32 1.442695, %v805_v30 }
 0x3dd   :  { %v817_v62 = vmul.f32 1.442695, %v807_v45  ;;  %v792_v10 = vpop.xlane.xlu1 %791 }
 0x3de   :  { %4205 = vpow2.f32 %v813_v44  ;;  %v808_v15 = vsub.f32 %v4783_v20, %v792_v10  ;;  %v529_v3 = vpop.xlane.xlu0 %528 }
 0x3df   :  { %v4916_v16 = vpop.eup %4199  ;;  %4207 = vpow2.f32 %v817_v62  ;;  %v547_v7 = vsub.f32 %v4788_v25, %v529_v3 }
 0x3e0   :  { %v819_v24 = vmul.f32 1.442695, %v808_v15  ;;  %v832_v47 = vsel %vm520_vm2, %v4916_v16, 0.0 }
 0x3e1   :  { %v557_v9 = vmul.f32 1.442695, %v547_v7  ;;  %v532_v48 = vpop.xlane.xlu1 %531  ;;  %833 = vadd.xlane.f32.xlu1 %v832_v47 }
 0x3e2   :  { %4209 = vpow2.f32 %v819_v24  ;;  %v548_v45 = vsub.f32 %v4798_v31, %v532_v48  ;;  %v795_v46 = vpop.xlane.xlu0 %794 }
 0x3e3   :  { %4211 = vpow2.f32 %v557_v9  ;;  %v809_v20 = vsub.f32 %v4808_v34, %v795_v46 }
 0x3e4   :  { %v4922_v44 = vpop.eup %4201  ;;  %v559_v13 = vmul.f32 1.442695, %v548_v45 }
 0x3e5   :  { %v4925_v39 = vpop.eup %4203  ;;  %v798_v25 = vpop.xlane.xlu1 %797  ;;  %v572_v37 = vsel %vm520_vm2, %v4922_v44, 0.0  ;;  %v821_v62 = vmul.f32 1.442695, %v809_v20 }
 0x3e6   :  { %4213 = vpow2.f32 %v559_v13  ;;  %v810_v49 = vsub.f32 %v4813_v50, %v798_v25  ;;  %573 = vadd.xlane.f32.xlu1 %v572_v37  ;;  %v535_v55 = vpop.xlane.xlu0 %534  ;;  %v569_v31 = vsel %vm520_vm2, %v4925_v39, 0.0 }
 0x3e7   :  { %570 = vadd.xlane.f32.xlu0 %v569_v31  ;;  %v549_v34 = vsub.f32 %v4818_v53, %v535_v55 }
 0x3e8   :  { %v4932_v30 = vpop.eup %4205  ;;  %v823_v10 = vmul.f32 1.442695, %v810_v49 }
 0x3e9   :  { %v4935_v15 = vpop.eup %4207  ;;  %v538_v3 = vpop.xlane.xlu1 %537  ;;  %v829_v7 = vsel %vm520_vm2, %v4932_v30, 0.0  ;;  %v561_v48 = vmul.f32 1.442695, %v549_v34 }
 0x3ea   :  { %4215 = vpow2.f32 %v823_v10  ;;  %v550_v50 = vsub.f32 %v4828_v60, %v538_v3  ;;  %830 = vadd.xlane.f32.xlu1 %v829_v7  ;;  %v801_v24 = vpop.xlane.xlu0 %800  ;;  %v835_v47 = vsel %vm520_vm2, %v4935_v15, 0.0 }
 0x3eb   :  { %836 = vadd.xlane.f32.xlu0 %v835_v47  ;;  %4217 = vpow2.f32 %v821_v62  ;;  %v811_v45 = vsub.f32 %v4838_v38, %v801_v24 }
 0x3ec   :  { %v4942_v9 = vpop.eup %4209  ;;  %v563_v53 = vmul.f32 1.442695, %v550_v50 }
 0x3ed   :  { %v4945_v46 = vpop.eup %4211  ;;  %v804_v13 = vpop.xlane.xlu1 %803  ;;  %v838_v20 = vsel %vm520_vm2, %v4942_v9, 0.0  ;;  %v825_v49 = vmul.f32 1.442695, %v811_v45 }
 0x3ee   :  { %4219 = vpow2.f32 %v563_v53  ;;  %v812_v60 = vsub.f32 %v4843_v2, %v804_v13  ;;  %839 = vadd.xlane.f32.xlu1 %v838_v20  ;;  %v575_v25 = vsel %vm520_vm2, %v4945_v46, 0.0 }
 0x3ef   :  { %576 = vadd.xlane.f32.xlu0 %v575_v25  ;;  %4221 = vpow2.f32 %v561_v48  ;;  %v1456_v25 = vmul.f32 %v4734_v23, %v4552_v61 }
 0x3f0   :  { %v4952_v37 = vpop.eup %4213  ;;  %v827_v55 = vmul.f32 1.442695, %v812_v60 }
 0x3f1   :  { %v544_v38 = vpop.xlane.xlu1 %543  ;;  %v578_v31 = vsel %vm520_vm2, %v4952_v37, 0.0 }
 0x3f2   :  { %4223 = vpow2.f32 %v827_v55  ;;  %v552_v62 = vsub.f32 %v4850_v11, %v544_v38  ;;  %579 = vadd.xlane.f32.xlu1 %v578_v31  ;;  %v1458_v38 = vmul.f32 %v4734_v23, %v4563_v8  ;;  %v1459_v31 = vmul.f32 %v4734_v23, %v4559_v4 }
 0x3f3   :  { %4225 = vpow2.f32 %v825_v49  ;;  %v1457_v49 = vmul.f32 %v4734_v23, %v4550_v59 }
 0x3f4   :  { %v4957_v10 = vpop.eup %4215  ;;  %v567_v2 = vmul.f32 1.442695, %v552_v62  ;;  %v4149_v62 = vpack.i.bf16 %v1459_v31, %v1458_v38 }
 0x3f5   :  { %v844_v34 = vsel %vm520_vm2, %v4957_v10, 0.0  ;;  %v4961_v3 = vpop.eup %4217  ;;  %v4144_v55 = vpack.i.bf16 %v1457_v49, %v1456_v25 }
 0x3f6   :  { %4227 = vpow2.f32 %v567_v2  ;;  %845 = vadd.xlane.f32.xlu0 %v844_v34  ;;  %v841_v11 = vsel %vm520_vm2, %v4961_v3, 0.0  ;;  %v1460_v2 = vmul.f32 %v4734_v23, %v4571_v18  ;;  %v1461_v34 = vmul.f32 %v4734_v23, %v4569_v14 }
 0x3f8   :  { %v4963_v7 = vpop.eup %4219 }
 0x3f9   :  { %v584_v50 = vsel %vm520_vm2, %v4963_v7, 0.0  ;;  %v4969_v24 = vpop.eup %4221 }
 0x3fa   :  { %585 = vadd.xlane.f32.xlu1 %v584_v50  ;;  %842 = vadd.xlane.f32.xlu0 %v841_v11  ;;  %v581_v53 = vsel %vm520_vm2, %v4969_v24, 0.0  ;;  %v1368_v50 = vpop.xlane.xlu1 %1367  ;;  %v4154_v11 = vpack.i.bf16 %v1461_v34, %v1460_v2 }
 0x3fb   :  { %v1388_v34 = vsub.f32 %v4855_v19, %v1368_v50 }
 0x3fc   :  { %v4971_v47 = vpop.eup %4223 }
 0x3fd   :  { %v850_v48 = vsel %vm520_vm2, %v4971_v47, 0.0  ;;  %v4977_v45 = vpop.eup %4225 }
 0x3fe   :  { %851 = vadd.xlane.f32.xlu1 %v850_v48  ;;  %582 = vadd.xlane.f32.xlu0 %v581_v53  ;;  %v847_v60 = vsel %vm520_vm2, %v4977_v45, 0.0  ;;  %v1639_v48 = vmul.f32 %v4732_v22, %v4542_v54  ;;  %v1640_v53 = vmul.f32 %v4732_v22, %v4540_v52 }
 0x400   :  { %v4979_v13 = vpop.eup %4227  ;;  %v4159_v25 = vpack.i.bf16 %v1640_v53, %v1639_v48  ;;  %v1397_v48 = vmul.f32 1.442695, %v1388_v34 }
 0x401   :  { %v590_v20 = vsel %vm520_vm2, %v4979_v13, 0.0 }
 0x402   :  { %591 = vadd.xlane.f32.xlu0 %v590_v20  ;;  %848 = vadd.xlane.f32.xlu1 %v847_v60  ;;  %v5003_v20 = vpop.permute.xlu0 %4140  ;;  %v1365_v60 = vpop.xlane.xlu1 %1364 }
 0x403   :  { %v1387_v31 = vsub.f32 %v4860_v27, %v1365_v60 }
 0x405   :  { %v1395_v43 = vmul.f32 1.442695, %v1387_v31 }
 0x413   :  { %4145 = vrot.lane.b32.xlu1 %v4144_v55, %s4380_s19  ;;  %v1374_v55 = vpop.xlane.xlu1 %1373 }
 0x414   :  { %v1390_v42 = vsub.f32 %v4865_v35, %v1374_v55 }
 0x417   :  { %v1386_v41 = vpop.xlane.xlu1 %1385 }
 0x418   :  { %4150 = vrot.lane.b32.xlu0 %v4149_v62, %s4380_s19  ;;  %v1394_v53 = vsub.f32 %v4874_v5, %v1386_v41 }
 0x41a   :  { %v1409_v27 = vmul.f32 1.442695, %v1394_v53 }
 0x41c   :  { %4155 = vrot.lane.b32.xlu0 %v4154_v11, %s4380_s19 }
 0x41f   :  { %v541_v49 = vpop.xlane.xlu0 %540 }
 0x420   :  { %4160 = vrot.lane.b32.xlu0 %v4159_v25, %s4379_s18  ;;  %v551_v23 = vsub.f32 %v4882_v17, %v541_v49  ;;  %v1401_v25 = vmul.f32 1.442695, %v1390_v42 }
 0x422   :  { %v565_v62 = vmul.f32 1.442695, %v551_v23 }
 0x423   :  { %v1371_v38 = vpop.xlane.xlu0 %1370 }
 0x424   :  { %4229 = vpow2.f32 %v565_v62  ;;  %v1389_v17 = vsub.f32 %v4885_v21, %v1371_v38 }
 0x425   :  { %4231 = vpow2.f32 %v1395_v43 }
 0x426   :  { %4233 = vpow2.f32 %v1397_v48  ;;  %v1399_v19 = vmul.f32 1.442695, %v1389_v17 }
 0x427   :  { %v1380_v2 = vpop.xlane.xlu0 %1379  ;;  %4235 = vpow2.f32 %v1401_v25 }
 0x428   :  { %v1392_v60 = vsub.f32 %v4890_v28, %v1380_v2  ;;  %4237 = vpow2.f32 %v1409_v27  ;;  %v1641_v27 = vmul.f32 %v4732_v22, %v4552_v61 }
 0x429   :  { %4239 = vpow2.f32 %v1399_v19 }
 0x42a   :  { %v1405_v23 = vmul.f32 1.442695, %v1392_v60  ;;  %v1642_v60 = vmul.f32 %v4732_v22, %v4550_v59 }
 0x42b   :  { %v1377_v11 = vpop.xlane.xlu0 %1376 }
 0x42c   :  { %v1391_v41 = vsub.f32 %v4895_v51, %v1377_v11  ;;  %4241 = vpow2.f32 %v1405_v23  ;;  %v4164_v19 = vpack.i.bf16 %v1642_v60, %v1641_v27  ;;  %v1644_v23 = vmul.f32 %v4732_v22, %v4559_v4 }
 0x42d   :  { %v4122_v60 = vunpack.i.l.bf16 %v4906_v63 }
 0x42e   :  { %v5015_v35 = vpop.eup %4229  ;;  %v1403_v21 = vmul.f32 1.442695, %v1391_v41 }
 0x42f   :  { %v1383_v49 = vpop.xlane.xlu0 %1382  ;;  %v587_v42 = vsel %vm520_vm2, %v5015_v35, 0.0  ;;  %v5020_v5 = vpop.eup %4231 }
 0x430   :  { %v1393_v50 = vsub.f32 %v4900_v26, %v1383_v49  ;;  %v5022_v28 = vpop.eup %4233  ;;  %v1411_v26 = vsel %vm520_vm2, %v5020_v5, 0.0 }
 0x431   :  { %v5026_v55 = vpop.eup %4235  ;;  %v1414_v38 = vsel %vm520_vm2, %v5022_v28, 0.0 }
 0x432   :  { %v1407_v43 = vmul.f32 1.442695, %v1393_v50  ;;  %v5028_v51 = vpop.eup %4237  ;;  %v1420_v31 = vsel %vm520_vm2, %v5026_v55, 0.0  ;;  %v1643_v50 = vmul.f32 %v4732_v22, %v4563_v8 }
 0x433   :  { %v5034_v62 = vpop.eup %4239  ;;  %v1432_v34 = vsel %vm520_vm2, %v5028_v51, 0.0 }
 0x434   :  { %4243 = vpow2.f32 %v1407_v43  ;;  %v1417_v11 = vsel %vm520_vm2, %v5034_v62, 0.0  ;;  %v4169_v41 = vpack.i.bf16 %v1644_v23, %v1643_v50  ;;  %v1645_v43 = vmul.f32 %v4732_v22, %v4571_v18 }
 0x435   :  { %4245 = vpow2.f32 %v1403_v21 }
 0x436   :  { %v5036_v2 = vpop.eup %4241 }
 0x437   :  { %588 = vadd.xlane.f32.xlu1 %v587_v42  ;;  %v1426_v53 = vsel %vm520_vm2, %v5036_v2, 0.0  ;;  %v1646_v42 = vmul.f32 %v4732_v22, %v4569_v14  ;;  %v4123_v22 = vunpack.i.h.bf16 %v4906_v63 }
 0x439   :  { %v4174_v21 = vpack.i.bf16 %v1646_v42, %v1645_v43 }
 0x43b   :  { %1412 = vadd.xlane.f32.xlu1 %v1411_v26 }
 0x43e   :  { %v5042_v48 = vpop.eup %4243 }
 0x43f   :  { %1415 = vadd.xlane.f32.xlu0 %v1414_v38  ;;  %1421 = vadd.xlane.f32.xlu1 %v1420_v31  ;;  %v1429_v25 = vsel %vm520_vm2, %v5042_v48, 0.0  ;;  %v5048_v17 = vpop.eup %4245 }
 0x440   :  { %v1423_v49 = vsel %vm520_vm2, %v5048_v17, 0.0 }
 0x443   :  { %1433 = vadd.xlane.f32.xlu1 %v1432_v34  ;;  %1418 = vadd.xlane.f32.xlu0 %v1417_v11 }
 0x447   :  { %1427 = vadd.xlane.f32.xlu0 %v1426_v53  ;;  %1430 = vadd.xlane.f32.xlu1 %v1429_v25 }
 0x44b   :  { %1424 = vadd.xlane.f32.xlu0 %v1423_v49 }
 0x458   :  { %4165 = vrot.lane.b32.xlu1 %v4164_v19, %s4379_s18 }
 0x461   :  { %4170 = vrot.lane.b32.xlu0 %v4169_v41, %s4379_s18 }
 0x465   :  { %4175 = vrot.lane.b32.xlu0 %v4174_v21, %s4379_s18 }
 0x46e   :  { %v834_v26 = vpop.xlane.xlu1 %833 }
 0x46f   :  { %4247 = vrcp.f32 %v834_v26  ;;  %v4128_v26 = vunpack.i.h.bf16 %v4736_v36 }
 0x473   :  { %v574_v38 = vpop.xlane.xlu1 %573 }
 0x474   :  { %v571_v31 = vpop.xlane.xlu0 %570 }
 0x477   :  { %v831_v34 = vpop.xlane.xlu1 %830 }
 0x478   :  { %4249 = vrcp.f32 %v831_v34  ;;  %v837_v11 = vpop.xlane.xlu0 %836  ;;  %v4127_v34 = vunpack.i.l.bf16 %v4736_v36 }
 0x479   :  { %4251 = vrcp.f32 %v837_v11  ;;  %v4248_v49 = vpop.eup %4247  ;;  %v3848_v11 = vpack.c.bf16 %v4123_v22, %v4122_v60  ;;  %v4142_v22 = vunpack.i.l.bf16 %v5003_v20 }
 0x47a   :  { %v862_v43 = vmul.f32 %v4248_v49, %v4916_v16  ;;  %v3852_v36 = vpack.c.bf16 %v4128_v26, %v4127_v34 }
 0x47b   :  { %v840_v53 = vpop.xlane.xlu1 %839 }
 0x47c   :  { %4253 = vrcp.f32 %v840_v53  ;;  %v577_v25 = vpop.xlane.xlu0 %576  ;;  %v4137_v53 = vunpack.i.l.bf16 %v4908_v32 }
 0x47f   :  { %v580_v50 = vpop.xlane.xlu1 %579 }
 0x482   :  { %v4250_v27 = vpop.eup %4249 }
 0x483   :  { %v4252_v19 = vpop.eup %4251  ;;  %v846_v23 = vpop.xlane.xlu0 %845  ;;  %v861_v41 = vmul.f32 %v4250_v27, %v4932_v30  ;;  %v4143_v27 = vunpack.i.h.bf16 %v5003_v20 }
 0x484   :  { %v863_v42 = vmul.f32 %v4252_v19, %v4935_v15  ;;  %4255 = vrcp.f32 %v846_v23  ;;  %v4138_v15 = vunpack.i.h.bf16 %v4908_v32 }
 0x485   :  { %3467 = vmatprep.mubr.msk.f32.mxu1 %vm520_vm2, %v861_v41  ;;  %v3884_v32 = vpack.c.bf16 %v4143_v27, %v4142_v22 }
 0x486   :  { %v4254_v21 = vpop.eup %4253  ;;  %3468 = vmatmul.mubr.msk.f32.vlgmr.msra.gmra.mrb[16].mxu1 %vm520_vm2, %v862_v43 }
 0x487   :  { %3847 = vmatpush3.bf16.msra.mxu1 %v4738_v57  ;;  %v586_v63 = vpop.xlane.xlu1 %585  ;;  %3470 = vmatprep.mubr.msk.f32.mxu1 %vm520_vm2, %v863_v42  ;;  %v843_v30 = vpop.xlane.xlu0 %842  ;;  %v864_v16 = vmul.f32 %v4254_v21, %v4942_v9  ;;  %v3856_v57 = vpack.c.bf16 %v4138_v15, %v4137_v53 }
 0x488   :  { %3849 = vmatprep.subr.bf16.mxu1 %v3848_v11  ;;  %4257 = vrcp.f32 %v843_v30 }
 0x489   :  { %4259 = vrcp.f32 %v571_v31 }
 0x48a   :  { %3471 = vmatmul.mubr.msk.f32.gmra.mrb[18].mxu1 %vm520_vm2, %v864_v16 }
 0x48b   :  { %3851 = vmatpush3.bf16.msra.mxu1 %v3848_v11  ;;  %v852_v49 = vpop.xlane.xlu1 %851  ;;  %v583_v9 = vpop.xlane.xlu0 %582 }
 0x48c   :  { %3853 = vmatprep.subr.bf16.mxu1 %v3852_v36  ;;  %4261 = vrcp.f32 %v852_v49 }
 0x48e   :  { %v4256_v19 = vpop.eup %4255 }
 0x48f   :  { %3855 = vmatpush3.bf16.msra.mxu1 %v3852_v36  ;;  %v849_v60 = vpop.xlane.xlu1 %848  ;;  %v592_v41 = vpop.xlane.xlu0 %591  ;;  %v866_v42 = vmul.f32 %v4256_v19, %v4957_v10 }
 0x490   :  { %3857 = vmatprep.subr.bf16.mxu1 %v3856_v57  ;;  %4263 = vrcp.f32 %v849_v60 }
 0x491   :  { %4265 = vrcp.f32 %v574_v38 }
 0x492   :  { %v4258_v23 = vpop.eup %4257  ;;  %4267 = vrcp.f32 %v577_v25 }
 0x493   :  { %3859 = vmatpush3.bf16.msra.mxu1 %v3856_v57  ;;  %v865_v43 = vmul.f32 %v4258_v23, %v4961_v3  ;;  %4269 = vrcp.f32 %v580_v50  ;;  %v4260_v20 = vpop.eup %4259  ;;  %v4146_v26 = vpop.permute.xlu1 %4145 }
 0x494   :  { %3885 = vmatprep.subr.bf16.mxu1 %v3884_v32  ;;  %4271 = vrcp.f32 %v583_v9  ;;  %v4151_v38 = vpop.permute.xlu0 %4150  ;;  %v601_v10 = vmul.f32 %v4260_v20, %v4925_v39  ;;  %v4148_v50 = vunpack.i.h.bf16 %v4146_v26  ;;  %v4147_v30 = vunpack.i.l.bf16 %v4146_v26 }
 0x495   :  { %3473 = vmatprep.mubr.msk.f32.mxu1 %vm520_vm2, %v865_v43  ;;  %4273 = vrcp.f32 %v586_v63  ;;  %v4153_v36 = vunpack.i.h.bf16 %v4151_v38  ;;  %v4152_v49 = vunpack.i.l.bf16 %v4151_v38 }
 0x496   :  { %3474 = vmatmul.mubr.msk.f32.gmra.mrb[20].mxu1 %vm520_vm2, %v866_v42  ;;  %v4262_v31 = vpop.eup %4261  ;;  %4275 = vrcp.f32 %v592_v41 }
 0x497   :  { %v868_v34 = vmul.f32 %v4262_v31, %v4971_v47  ;;  %v3888_v47 = vpack.c.bf16 %v4148_v50, %v4147_v30 }
 0x498   :  { %v4156_v15 = vpop.permute.xlu0 %4155 }
 0x499   :  { %v4158_v22 = vunpack.i.h.bf16 %v4156_v15  ;;  %v4157_v9 = vunpack.i.l.bf16 %v4156_v15 }
 0x49a   :  { %v4264_v21 = vpop.eup %4263 }
 0x49b   :  { %v867_v25 = vmul.f32 %v4264_v21, %v4977_v45  ;;  %v4266_v11 = vpop.eup %4265  ;;  %v3896_v19 = vpack.c.bf16 %v4158_v22, %v4157_v9 }
 0x49c   :  { %v4268_v3 = vpop.eup %4267  ;;  %v602_v63 = vmul.f32 %v4266_v11, %v4922_v44  ;;  %v3892_v44 = vpack.c.bf16 %v4153_v36, %v4152_v49 }
 0x49d   :  { %3476 = vmatprep.mubr.msk.f32.mxu1 %vm520_vm2, %v867_v25  ;;  %v4270_v16 = vpop.eup %4269  ;;  %v603_v45 = vmul.f32 %v4268_v3, %v4945_v46  ;;  %v4161_v46 = vpop.permute.xlu0 %4160 }
 0x49e   :  { %3477 = vmatmul.mubr.msk.f32.gmra.mrb[22].mxu1 %vm520_vm2, %v868_v34  ;;  %v4272_v53 = vpop.eup %4271  ;;  %v604_v39 = vmul.f32 %v4270_v16, %v4952_v37  ;;  %v4162_v23 = vunpack.i.l.bf16 %v4161_v46 }
 0x49f   :  { %3495 = vmatprep.mubr.msk.f32.mxu1 %vm520_vm2, %v601_v10  ;;  %v4274_v57 = vpop.eup %4273  ;;  %v605_v27 = vmul.f32 %v4272_v53, %v4969_v24 }
 0x4a0   :  { %v606_v60 = vmul.f32 %v4274_v57, %v4963_v7  ;;  %v4276_v7 = vpop.eup %4275 }
 0x4a1   :  { %v608_v25 = vmul.f32 %v4276_v7, %v4979_v13 }
 0x4a2   :  { %3496 = vmatmul.mubr.msk.f32.vlgmr.msra.gmra.mrb[16].mxu1 %vm520_vm2, %v602_v63 }
 0x4a3   :  { %3887 = vmatpush3.bf16.msra.mxu1 %v3884_v32  ;;  %3498 = vmatprep.mubr.msk.f32.mxu1 %vm520_vm2, %v603_v45  ;;  %v4163_v32 = vunpack.i.h.bf16 %v4161_v46 }
 0x4a4   :  { %3889 = vmatprep.subr.bf16.mxu1 %v3888_v47 }
 0x4a5   :  { %v3900_v37 = vpack.c.bf16 %v4163_v32, %v4162_v23 }
 0x4a6   :  { %3499 = vmatmul.mubr.msk.f32.gmra.mrb[18].mxu1 %vm520_vm2, %v604_v39 }
 0x4a7   :  { %3891 = vmatpush3.bf16.msra.mxu1 %v3888_v47  ;;  %3501 = vmatprep.mubr.msk.f32.mxu1 %vm520_vm2, %v605_v27 }
 0x4a8   :  { %3893 = vmatprep.subr.bf16.mxu1 %v3892_v44 }
 0x4aa   :  { %3502 = vmatmul.mubr.msk.f32.gmra.mrb[20].mxu1 %vm520_vm2, %v606_v60 }
 0x4ab   :  { %3895 = vmatpush3.bf16.msra.mxu1 %v3892_v44 }
 0x4ac   :  { %3897 = vmatprep.subr.bf16.mxu1 %v3896_v19 }
 0x4af   :  { %3899 = vmatpush3.bf16.msra.mxu1 %v3896_v19 }
 0x4b0   :  { %3902 = vmatprep.subr.msk.bf16.mxu1 %vm4608_vm1, %v3900_v37 }
 0x4c4   :  { %v589_v24 = vpop.xlane.xlu1 %588 }
 0x4c5   :  { %4277 = vrcp.f32 %v589_v24 }
 0x4c8   :  { %v1413_v43 = vpop.xlane.xlu1 %1412 }
 0x4c9   :  { %4279 = vrcp.f32 %v1413_v43 }
 0x4cc   :  { %v1422_v42 = vpop.xlane.xlu1 %1421  ;;  %v1416_v20 = vpop.xlane.xlu0 %1415 }
 0x4cd   :  { %4281 = vrcp.f32 %v1416_v20 }
 0x4ce   :  { %4283 = vrcp.f32 %v1422_v42 }
 0x4cf   :  { %v4278_v31 = vpop.eup %4277 }
 0x4d0   :  { %v1434_v21 = vpop.xlane.xlu1 %1433  ;;  %v1419_v26 = vpop.xlane.xlu0 %1418  ;;  %v607_v38 = vmul.f32 %v4278_v31, %v5015_v35 }
 0x4d1   :  { %4285 = vrcp.f32 %v1419_v26 }
 0x4d2   :  { %3504 = vmatprep.mubr.msk.f32.mxu1 %vm520_vm2, %v607_v38 }
 0x4d3   :  { %v4280_v41 = vpop.eup %4279  ;;  %3505 = vmatmul.mubr.msk.f32.gmra.mrb[22].mxu1 %vm520_vm2, %v608_v25 }
 0x4d4   :  { %v1431_v34 = vpop.xlane.xlu1 %1430  ;;  %v1428_v11 = vpop.xlane.xlu0 %1427  ;;  %v1443_v10 = vmul.f32 %v4280_v41, %v5020_v5 }
 0x4d5   :  { %4287 = vrcp.f32 %v1431_v34 }
 0x4d6   :  { %3551 = vmatprep.mubr.msk.f32.mxu1 %vm520_vm2, %v1443_v10  ;;  %4289 = vrcp.f32 %v1428_v11 }
 0x4d7   :  { %v4282_v3 = vpop.eup %4281 }
 0x4d8   :  { %v4166_v50 = vpop.permute.xlu1 %4165  ;;  %v1425_v35 = vpop.xlane.xlu0 %1424  ;;  %v1444_v30 = vmul.f32 %v4282_v3, %v5022_v28 }
 0x4d9   :  { %v4168_v13 = vunpack.i.h.bf16 %v4166_v50  ;;  %v4167_v63 = vunpack.i.l.bf16 %v4166_v50  ;;  %4291 = vrcp.f32 %v1425_v35  ;;  %v4284_v16 = vpop.eup %4283 }
 0x4da   :  { %3552 = vmatmul.mubr.msk.f32.vlgmr.msra.gmra.mrb[16].mxu1 %vm520_vm2, %v1444_v30  ;;  %4293 = vrcp.f32 %v1434_v21  ;;  %v1446_v28 = vmul.f32 %v4284_v16, %v5026_v55 }
 0x4db   :  { %v3906_v15 = vpack.c.bf16 %v4168_v13, %v4167_v63  ;;  %v4286_v45 = vpop.eup %4285  ;;  %3905 = vmatpush3.bf16.xpose.msk.msra.mxu1 %vm4608_vm1, %v3900_v37 }
 0x4dc   :  { %v4171_v5 = vpop.permute.xlu0 %4170  ;;  %v1445_v53 = vmul.f32 %v4286_v45, %v5034_v62 }
 0x4dd   :  { %3908 = vmatprep.subr.msk.bf16.mxu1 %vm4608_vm1, %v3906_v15  ;;  %v4173_v47 = vunpack.i.h.bf16 %v4171_v5  ;;  %v4172_v36 = vunpack.i.l.bf16 %v4171_v5 }
 0x4de   :  { %3554 = vmatprep.mubr.msk.f32.mxu1 %vm520_vm2, %v1445_v53 }
 0x4df   :  { %3555 = vmatmul.mubr.msk.f32.gmra.mrb[18].mxu1 %vm520_vm2, %v1446_v28  ;;  %v4288_v49 = vpop.eup %4287  ;;  %v3912_v27 = vpack.c.bf16 %v4173_v47, %v4172_v36 }
 0x4e0   :  { %v4290_v39 = vpop.eup %4289  ;;  %v4176_v44 = vpop.permute.xlu0 %4175  ;;  %v1449_v9 = vmul.f32 %v4288_v49, %v5042_v48 }
 0x4e1   :  { %v1448_v55 = vmul.f32 %v4290_v39, %v5036_v2  ;;  %v4178_v46 = vunpack.i.h.bf16 %v4176_v44  ;;  %v4177_v60 = vunpack.i.l.bf16 %v4176_v44 }
 0x4e3   :  { %v4292_v57 = vpop.eup %4291  ;;  %3911 = vmatpush3.bf16.xpose.msk.msra.mxu1 %vm4608_vm1, %v3906_v15  ;;  %v3918_v32 = vpack.c.bf16 %v4178_v46, %v4177_v60 }
 0x4e4   :  { %v1447_v22 = vmul.f32 %v4292_v57, %v5048_v17  ;;  %3914 = vmatprep.subr.msk.bf16.mxu1 %vm4608_vm1, %v3912_v27  ;;  %v4294_v62 = vpop.eup %4293 }
 0x4e5   :  { %v1450_v19 = vmul.f32 %v4294_v62, %v5028_v51 }
 0x4e6   :  { %3557 = vmatprep.mubr.msk.f32.mxu1 %vm520_vm2, %v1447_v22 }
 0x4e7   :  { %3558 = vmatmul.mubr.msk.f32.gmra.mrb[20].mxu1 %vm520_vm2, %v1448_v55 }
 0x4e8   :  { %3560 = vmatprep.mubr.msk.f32.mxu1 %vm520_vm2, %v1449_v9 }
 0x4eb   :  { %3561 = vmatmul.mubr.msk.f32.gmra.mrb[22].mxu1 %vm520_vm2, %v1450_v19 }
 0x4ec   :  { %3917 = vmatpush3.bf16.xpose.msk.msra.mxu1 %vm4608_vm1, %v3912_v27  ;;  %3579 = vmatprep.mubr.msk.f32.mxu1 %vm205_vm0, %v4542_v54 }
 0x4ed   :  { %3920 = vmatprep.subr.msk.bf16.mxu1 %vm4608_vm1, %v3918_v32 }
 0x4f4   :  { %3923 = vmatpush3.bf16.xpose.msk.msra.mxu1 %vm4608_vm1, %v3918_v32 }
 0x4fb   :  { %3580 = vmatmul.mubr.msk.f32.vlgmr.msra.gmra.mrb[24].mxu1 %vm205_vm0, %v4540_v52 }
 0x4fc   :  { %3582 = vmatprep.mubr.msk.f32.mxu1 %vm205_vm0, %v4552_v61 }
 0x4ff   :  { %3583 = vmatmul.mubr.msk.f32.gmra.mrb[26].mxu1 %vm205_vm0, %v4550_v59 }
 0x500   :  { %3585 = vmatprep.mubr.msk.f32.mxu1 %vm205_vm0, %v4563_v8 }
 0x503   :  { %3586 = vmatmul.mubr.msk.f32.gmra.mrb[28].mxu1 %vm205_vm0, %v4559_v4 }
 0x504   :  { %3588 = vmatprep.mubr.msk.f32.mxu1 %vm205_vm0, %v4571_v18 }
 0x507   :  { %3589 = vmatmul.mubr.msk.f32.gmra.mrb[30].mxu1 %vm205_vm0, %v4569_v14 }
 0x5ce   :  { %v3581_v58 = vpop.f32.mrb[24].mxu1 }
 0x5cf   :  { %v1759_v51 = vadd.f32 %v3581_v58, %v4744_v40  ;;  %v1753_v2 = vpop.f32.mrb[25].mxu1 }
 0x5d0   :  { %v1754_v48 = vadd.f32 %v1753_v2, %v4754_v1 }
 0x5d1   :  { %v1795_v17 = vsel %vm520_vm2, %v1759_v51, -inf }
 0x5d2   :  { %1796 = vmax.xlane.f32.xlu0 %v1795_v17  ;;  %v3584_v23 = vpop.f32.mrb[26].mxu1  ;;  %v1792_v37 = vsel %vm520_vm2, %v1754_v48, -inf }
 0x5d3   :  { %v1769_v24 = vadd.f32 %v3584_v23, %v4775_v12  ;;  %v1763_v43 = vpop.f32.mrb[27].mxu1  ;;  %1793 = vmax.xlane.f32.xlu1 %v1792_v37 }
 0x5d4   :  { %v1764_v42 = vadd.f32 %v1763_v43, %v4762_v6 }
 0x5d5   :  { %v1801_v20 = vsel %vm520_vm2, %v1769_v24, -inf }
 0x5d6   :  { %v3587_v7 = vpop.f32.mrb[28].mxu1  ;;  %v1798_v40 = vsel %vm520_vm2, %v1764_v42, -inf }
 0x5d7   :  { %v1779_v31 = vadd.f32 %v3587_v7, %v4805_v33  ;;  %v1773_v1 = vpop.f32.mrb[29].mxu1  ;;  %1799 = vmax.xlane.f32.xlu0 %v1798_v40  ;;  %1802 = vmax.xlane.f32.xlu1 %v1801_v20 }
 0x5d8   :  { %v1774_v21 = vadd.f32 %v1773_v1, %v4795_v29  ;;  %v4353_v29 = vld [vmem:[%s5499_s1 + $0x191] ss:$0 sm:$0xff] }
 0x5d9   :  { %v1807_v26 = vsel %vm520_vm2, %v1779_v31, -inf }
 0x5da   :  { %v3590_v38 = vpop.f32.mrb[30].mxu1  ;;  %v1804_v12 = vsel %vm520_vm2, %v1774_v21, -inf }
 0x5db   :  { %v1789_v25 = vadd.f32 %v3590_v38, %v4835_v0  ;;  %v1783_v6 = vpop.f32.mrb[31].mxu1  ;;  %1805 = vmax.xlane.f32.xlu0 %v1804_v12  ;;  %1808 = vmax.xlane.f32.xlu1 %v1807_v26  ;;  %v32_v26 = vld [vmem:[%s5499_s1 + $0xa0] sm:$0xff]  ;;  %v33_v38 = vld [vmem:[%s5499_s1 + $0xa8] sm:$0xff]  ;;  %v34_v12 = vld [vmem:[%s5499_s1 + $0xb0] sm:$0xff] }
 0x5dc   :  { %v5170_v41 = vadd.f32 %v1783_v6, %v4825_v56 }
 0x5dd   :  { %v1813_v33 = vsel %vm520_vm2, %v1789_v25, -inf }
 0x5de   :  { %v1810_v34 = vsel %vm520_vm2, %v5170_v41, -inf }
 0x5df   :  { %1811 = vmax.xlane.f32.xlu0 %v1810_v34  ;;  %1814 = vmax.xlane.f32.xlu1 %v1813_v33 }
 0x5f5   :  { %1880 = vrot.lane.b32.xlu0 %v4353_v29, %s4380_s19 }
 0x65f   :  { %v1797_v0 = vpop.xlane.xlu0 %1796 }
 0x660   :  { %v1817_v11 = vsub.f32 %v1759_v51, %v1797_v0  ;;  %v1794_v10 = vpop.xlane.xlu1 %1793 }
 0x661   :  { %v1816_v3 = vsub.f32 %v1754_v48, %v1794_v10 }
 0x662   :  { %v1826_v50 = vmul.f32 1.442695, %v1817_v11 }
 0x663   :  { %v1824_v56 = vmul.f32 1.442695, %v1816_v3 }
 0x664   :  { %4295 = vpow2.f32 %v1826_v50  ;;  %v1800_v35 = vpop.xlane.xlu0 %1799  ;;  %v1803_v30 = vpop.xlane.xlu1 %1802 }
 0x665   :  { %v1819_v13 = vsub.f32 %v1769_v24, %v1803_v30  ;;  %4297 = vpow2.f32 %v1824_v56  ;;  %v1818_v63 = vsub.f32 %v1764_v42, %v1800_v35 }
 0x667   :  { %v1830_v16 = vmul.f32 1.442695, %v1819_v13  ;;  %v1828_v5 = vmul.f32 1.442695, %v1818_v63 }
 0x668   :  { %v1806_v15 = vpop.xlane.xlu0 %1805  ;;  %v1809_v45 = vpop.xlane.xlu1 %1808 }
 0x669   :  { %4299 = vpow2.f32 %v1830_v16  ;;  %v1821_v53 = vsub.f32 %v1779_v31, %v1809_v45  ;;  %v1820_v36 = vsub.f32 %v1774_v21, %v1806_v15 }
 0x66a   :  { %4301 = vpow2.f32 %v1828_v5 }
 0x66b   :  { %v1834_v49 = vmul.f32 1.442695, %v1821_v53  ;;  %v1832_v55 = vmul.f32 1.442695, %v1820_v36 }
 0x66c   :  { %v1812_v28 = vpop.xlane.xlu0 %1811 }
 0x66d   :  { %4303 = vpow2.f32 %v1834_v49 }
 0x66e   :  { %v5179_v47 = vpop.eup %4295  ;;  %4305 = vpow2.f32 %v1832_v55 }
 0x66f   :  { %v1843_v39 = vsel %vm520_vm2, %v5179_v47, 0.0  ;;  %v5183_v57 = vpop.eup %4297 }
 0x670   :  { %v1881_v27 = vpop.permute.xlu0 %1880  ;;  %1844 = vadd.xlane.f32.xlu1 %v1843_v39  ;;  %v1840_v62 = vsel %vm520_vm2, %v5183_v57, 0.0 }
 0x671   :  { %v1883_v44 = vmul.f32 %v1881_v27, %v4542_v54  ;;  %v1884_v22 = vmul.f32 %v1881_v27, %v4540_v52  ;;  %v1815_v54 = vpop.xlane.xlu1 %1814  ;;  %v1885_v23 = vmul.f32 %v1881_v27, %v4552_v61  ;;  %v1886_v37 = vmul.f32 %v1881_v27, %v4550_v59 }
 0x672   :  { %v1823_v58 = vsub.f32 %v1789_v25, %v1815_v54  ;;  %v1887_v20 = vmul.f32 %v1881_v27, %v4563_v8  ;;  %v1888_v7 = vmul.f32 %v1881_v27, %v4559_v4  ;;  %v1822_v61 = vsub.f32 %v5170_v41, %v1812_v28 }
 0x673   :  { %v4179_v9 = vpack.i.bf16 %v1884_v22, %v1883_v44  ;;  %v5189_v46 = vpop.eup %4299  ;;  %v4184_v42 = vpack.i.bf16 %v1886_v37, %v1885_v23  ;;  %v1889_v8 = vmul.f32 %v1881_v27, %v4571_v18  ;;  %v1890_v4 = vmul.f32 %v1881_v27, %v4569_v14  ;;  %v35_v14 = vld [vmem:[%s5499_s1 + $0xb8] sm:$0xff] }
 0x674   :  { %1841 = vadd.xlane.f32.xlu1 %v1840_v62  ;;  %v1849_v60 = vsel %vm520_vm2, %v5189_v46, 0.0  ;;  %v5194_v19 = vpop.eup %4301  ;;  %v1838_v48 = vmul.f32 1.442695, %v1823_v58  ;;  %v4189_v40 = vpack.i.bf16 %v1888_v7, %v1887_v20  ;;  %v1836_v31 = vmul.f32 1.442695, %v1822_v61 }
 0x675   :  { %4180 = vrot.lane.b32.xlu0 %v4179_v9, %s4380_s19  ;;  %v1846_v52 = vsel %vm520_vm2, %v5194_v19, 0.0  ;;  %v4194_v21 = vpack.i.bf16 %v1890_v4, %v1889_v8  ;;  %v3940_v25 = vpack.c.bf16 %v33_v38, %v32_v26  ;;  %v3944_v18 = vpack.c.bf16 %v35_v14, %v34_v12  ;;  %v3088_v20 = vld [vmem:[%s5499_s1 + $0x181] ss:$0 sm:$0xff]  ;;  %v5521_v26 = vld [vmem:[#allocation7_spill] sm:$0xff] }
 0x676   :  { %4307 = vpow2.f32 %v1838_v48  ;;  %v5522_v14 = vld [vmem:[#allocation8_spill] sm:$0xff] }
 0x677   :  { %v5198_v32 = vpop.eup %4303  ;;  %4309 = vpow2.f32 %v1836_v31  ;;  %3941 = vmatprep.subr.bf16.mxu0 %v3940_v25 }
 0x678   :  { %1850 = vadd.xlane.f32.xlu1 %v1849_v60  ;;  %v1855_v51 = vsel %vm520_vm2, %v5198_v32, 0.0  ;;  %v5202_v2 = vpop.eup %4305  ;;  %3943 = vmatpush3.bf16.msra.mxu0 %v3940_v25 }
 0x679   :  { %v1852_v17 = vsel %vm520_vm2, %v5202_v2, 0.0  ;;  %3945 = vmatprep.subr.bf16.mxu0 %v3944_v18 }
 0x67c   :  { %1847 = vadd.xlane.f32.xlu1 %v1846_v52  ;;  %3947 = vmatpush3.bf16.msra.mxu0 %v3944_v18 }
 0x680   :  { %1856 = vadd.xlane.f32.xlu1 %v1855_v51  ;;  %v5208_v24 = vpop.eup %4307 }
 0x681   :  { %v1861_v43 = vsel %vm520_vm2, %v5208_v24, 0.0  ;;  %v5217_v59 = vpop.eup %4309 }
 0x682   :  { %v1858_v1 = vsel %vm520_vm2, %v5217_v59, 0.0 }
 0x684   :  { %1853 = vadd.xlane.f32.xlu1 %v1852_v17 }
 0x694   :  { %1862 = vadd.xlane.f32.xlu0 %v1861_v43 }
 0x695   :  { %4185 = vrot.lane.b32.xlu1 %v4184_v42, %s4380_s19 }
 0x699   :  { %4190 = vrot.lane.b32.xlu1 %v4189_v40, %s4380_s19  ;;  %v5519_v40 = vld [vmem:[#allocation5_spill] sm:$0xff] }
 0x6bd   :  { %1859 = vadd.xlane.f32.xlu1 %v1858_v1 }
 0x6ce   :  { %4195 = vrot.lane.b32.xlu1 %v4194_v21, %s4380_s19 }
 0x6e7   :  { %v4181_v6 = vpop.permute.xlu0 %4180 }
 0x6e8   :  { %v4183_v41 = vunpack.i.h.bf16 %v4181_v6  ;;  %v4182_v33 = vunpack.i.l.bf16 %v4181_v6 }
 0x6ea   :  { %v3924_v34 = vpack.c.bf16 %v4183_v41, %v4182_v33 }
 0x6ec   :  { %3925 = vmatprep.subr.bf16.mxu1 %v3924_v34 }
 0x6ed   :  { %3927 = vmatpush3.bf16.msra.mxu1 %v3924_v34 }
 0x6fd   :  { %v1845_v29 = vpop.xlane.xlu1 %1844 }
 0x701   :  { %v1842_v0 = vpop.xlane.xlu1 %1841 }
 0x702   :  { %4311 = vrcp.f32 %v1842_v0 }
 0x703   :  { %4313 = vrcp.f32 %v1845_v29  ;;  %v5523_v29 = vld [vmem:[#allocation9_spill] sm:$0xff] }
 0x705   :  { %v1851_v11 = vpop.xlane.xlu1 %1850 }
 0x709   :  { %v1848_v10 = vpop.xlane.xlu1 %1847 }
 0x70a   :  { %4315 = vrcp.f32 %v1848_v10 }
 0x70b   :  { %4317 = vrcp.f32 %v1851_v11 }
 0x70c   :  { %v4312_v3 = vpop.eup %4311 }
 0x70d   :  { %v1857_v50 = vpop.xlane.xlu1 %1856  ;;  %v1872_v56 = vmul.f32 %v4312_v3, %v5183_v57  ;;  %v4314_v44 = vpop.eup %4313  ;;  %v5524_v3 = vld [vmem:[#allocation10_spill] sm:$0xff] }
 0x70e   :  { %v1873_v55 = vmul.f32 %v4314_v44, %v5179_v47 }
 0x70f   :  { %3607 = vmatprep.mubr.msk.f32.mxu1 %vm520_vm2, %v1872_v56 }
 0x711   :  { %v1854_v35 = vpop.xlane.xlu1 %1853 }
 0x712   :  { %4319 = vrcp.f32 %v1854_v35 }
 0x713   :  { %4321 = vrcp.f32 %v1857_v50 }
 0x714   :  { %v4316_v22 = vpop.eup %4315 }
 0x715   :  { %v4186_v30 = vpop.permute.xlu1 %4185  ;;  %v4318_v62 = vpop.eup %4317  ;;  %v1874_v9 = vmul.f32 %v4316_v22, %v5194_v19 }
 0x716   :  { %v4188_v13 = vunpack.i.h.bf16 %v4186_v30  ;;  %v4187_v63 = vunpack.i.l.bf16 %v4186_v30  ;;  %v1875_v54 = vmul.f32 %v4318_v62, %v5189_v46  ;;  %v5525_v30 = vld [vmem:[#allocation11_spill] sm:$0xff] }
 0x718   :  { %v3928_v16 = vpack.c.bf16 %v4188_v13, %v4187_v63 }
 0x719   :  { %v4191_v15 = vpop.permute.xlu1 %4190 }
 0x71a   :  { %v4193_v45 = vunpack.i.h.bf16 %v4191_v15  ;;  %v4192_v5 = vunpack.i.l.bf16 %v4191_v15  ;;  %3929 = vmatprep.subr.bf16.mxu1 %v3928_v16  ;;  %v5526_v15 = vld [vmem:[#allocation12_spill] sm:$0xff] }
 0x71b   :  { %3931 = vmatpush3.bf16.msra.mxu1 %v3928_v16 }
 0x71c   :  { %v3932_v53 = vpack.c.bf16 %v4193_v45, %v4192_v5  ;;  %v4320_v60 = vpop.eup %4319 }
 0x71d   :  { %v4322_v52 = vpop.eup %4321  ;;  %v1876_v58 = vmul.f32 %v4320_v60, %v5202_v2 }
 0x71e   :  { %3933 = vmatprep.subr.bf16.mxu1 %v3932_v53  ;;  %v1877_v47 = vmul.f32 %v4322_v52, %v5198_v32 }
 0x71f   :  { %3935 = vmatpush3.bf16.msra.mxu1 %v3932_v53 }
 0x721   :  { %v1863_v57 = vpop.xlane.xlu0 %1862 }
 0x74a   :  { %v1860_v28 = vpop.xlane.xlu1 %1859 }
 0x74b   :  { %4323 = vrcp.f32 %v1860_v28 }
 0x74c   :  { %4325 = vrcp.f32 %v1863_v57 }
 0x74e   :  { %v4196_v36 = vpop.permute.xlu1 %4195 }
 0x74f   :  { %v4198_v49 = vunpack.i.h.bf16 %v4196_v36  ;;  %v4197_v39 = vunpack.i.l.bf16 %v4196_v36 }
 0x751   :  { %v3936_v27 = vpack.c.bf16 %v4198_v49, %v4197_v39 }
 0x753   :  { %3937 = vmatprep.subr.bf16.mxu1 %v3936_v27 }
 0x754   :  { %3939 = vmatpush3.bf16.msra.mxu1 %v3936_v27 }
 0x755   :  { %v4324_v51 = vpop.eup %4323 }
 0x756   :  { %v4326_v48 = vpop.eup %4325  ;;  %v1878_v19 = vmul.f32 %v4324_v51, %v5217_v59  ;;  %v5520_v59 = vld [vmem:[#allocation6_spill] sm:$0xff] }
 0x757   :  { %3608 = vmatmul.mubr.msk.f32.vlgmr.msra.gmra.mrb[16].mxu1 %vm520_vm2, %v1873_v55  ;;  %v1879_v17 = vmul.f32 %v4326_v48, %v5208_v24 }
 0x758   :  { %3610 = vmatprep.mubr.msk.f32.mxu1 %vm520_vm2, %v1874_v9 }
 0x75b   :  { %3611 = vmatmul.mubr.msk.f32.gmra.mrb[18].mxu1 %vm520_vm2, %v1875_v54 }
 0x75c   :  { %3613 = vmatprep.mubr.msk.f32.mxu1 %vm520_vm2, %v1876_v58 }
 0x75f   :  { %3614 = vmatmul.mubr.msk.f32.gmra.mrb[20].mxu1 %vm520_vm2, %v1877_v47 }
 0x760   :  { %3616 = vmatprep.mubr.msk.f32.mxu1 %vm520_vm2, %v1878_v19 }
 0x763   :  { %3617 = vmatmul.mubr.msk.f32.gmra.mrb[22].mxu1 %vm520_vm2, %v1879_v17 }
 0x82a   :  { %v3609_v46 = vpop.f32.mrb[16].mxu1 }
 0x82b   :  { %v2013_v2 = vpop.f32.mrb[17].mxu1 }
 0x82c   :  { %3627 = vmatprep.mubr.msk.f32.mxu0 %vm205_vm0, %v2013_v2 }
 0x82d   :  { %3628 = vmatmul.mubr.msk.f32.vlgmr.msra.gmra.mrb[24].mxu0 %vm205_vm0, %v3609_v46 }
 0x82e   :  { %v3612_v23 = vpop.f32.mrb[18].mxu1 }
 0x82f   :  { %v2023_v37 = vpop.f32.mrb[19].mxu1 }
 0x830   :  { %3630 = vmatprep.mubr.msk.f32.mxu0 %vm205_vm0, %v2023_v37 }
 0x831   :  { %3631 = vmatmul.mubr.msk.f32.gmra.mrb[26].mxu0 %vm205_vm0, %v3612_v23 }
 0x832   :  { %v3615_v32 = vpop.f32.mrb[20].mxu1 }
 0x833   :  { %v2033_v43 = vpop.f32.mrb[21].mxu1 }
 0x834   :  { %3633 = vmatprep.mubr.msk.f32.mxu0 %vm205_vm0, %v2033_v43 }
 0x835   :  { %3634 = vmatmul.mubr.msk.f32.gmra.mrb[28].mxu0 %vm205_vm0, %v3615_v32 }
 0x836   :  { %v3618_v24 = vpop.f32.mrb[22].mxu1 }
 0x837   :  { %v2043_v42 = vpop.f32.mrb[23].mxu1 }
 0x838   :  { %3636 = vmatprep.mubr.msk.f32.mxu0 %vm205_vm0, %v2043_v42 }
 0x839   :  { %3637 = vmatmul.mubr.msk.f32.gmra.mrb[30].mxu0 %vm205_vm0, %v3618_v24 }
 0x900   :  { %v3629_v7 = vpop.f32.mrb[24].mxu0 }
 0x901   :  { %v2190_v61 = vadd.f32 %v3629_v7, %v5519_v40  ;;  %v2150_v31 = vpop.f32.mrb[25].mxu0 }
 0x902   :  { %v2189_v1 = vadd.f32 %v2150_v31, %v5520_v59 }
 0x903   :  { %v2202_v8 = vadd.f32 %v3088_v20, %v2190_v61 }
 0x904   :  { %v2201_v4 = vadd.f32 %v3088_v20, %v2189_v1  ;;  %v3632_v21 = vpop.f32.mrb[26].mxu0 }
 0x905   :  { %v2192_v38 = vadd.f32 %v3632_v21, %v5521_v26  ;;  %v2160_v12 = vpop.f32.mrb[27].mxu0  ;;  %v2212_v25 = vsel %vm205_vm0, %v2202_v8, 0.0 }
 0x906   :  { %v2191_v18 = vadd.f32 %v2160_v12, %v5522_v14  ;;  %2213 = vadd.xlane.f32.xlu0 %v2212_v25  ;;  %v2209_v6 = vsel %vm205_vm0, %v2201_v4, 0.0 }
 0x907   :  { %v2204_v41 = vadd.f32 %v3088_v20, %v2192_v38  ;;  %2210 = vadd.xlane.f32.xlu1 %v2209_v6 }
 0x908   :  { %v3635_v33 = vpop.f32.mrb[28].mxu0  ;;  %v2203_v34 = vadd.f32 %v3088_v20, %v2191_v18 }
 0x909   :  { %v2194_v0 = vadd.f32 %v3635_v33, %v5523_v29  ;;  %v2170_v11 = vpop.f32.mrb[29].mxu0  ;;  %v2218_v10 = vsel %vm205_vm0, %v2204_v41, 0.0  ;;  %v4383_v33 = vmov 0.0   ;;  %v37_v29 = vld [vmem:[%s5499_s1 + $0xc8] sm:$0xff] }
 0x90a   :  { %v2193_v50 = vadd.f32 %v2170_v11, %v5524_v3  ;;  %2219 = vadd.xlane.f32.xlu0 %v2218_v10  ;;  %v2215_v16 = vsel %vm205_vm0, %v2203_v34, 0.0  ;;  %3655 = vmatprep.mubr.msk.f32.mxu0 %vm4382_vm3, %v4383_v33  ;;  %v39_v10 = vld [vmem:[%s5499_s1 + $0xd8] sm:$0xff] }
 0x90b   :  { %v2206_v35 = vadd.f32 %v3088_v20, %v2194_v0  ;;  %3696 = vmatprep.mubr.msk.f32.mxu1 %vm4382_vm3, %v4383_v33  ;;  %v38_v0 = vld [vmem:[%s5499_s1 + $0xd0] sm:$0xff] }
 0x90c   :  { %v3638_v56 = vpop.f32.mrb[30].mxu0  ;;  %v2205_v5 = vadd.f32 %v3088_v20, %v2193_v50  ;;  %v3982_v3 = vpack.c.bf16 %v39_v10, %v38_v0 }
 0x90d   :  { %v2196_v13 = vadd.f32 %v3638_v56, %v5525_v30  ;;  %v2180_v63 = vpop.f32.mrb[31].mxu0  ;;  %v2224_v53 = vsel %vm205_vm0, %v2206_v35, 0.0 }
 0x90e   :  { %v2195_v45 = vadd.f32 %v2180_v63, %v5526_v15  ;;  %2216 = vadd.xlane.f32.xlu0 %v2215_v16  ;;  %v2221_v36 = vsel %vm205_vm0, %v2205_v5, 0.0 }
 0x90f   :  { %v2208_v49 = vadd.f32 %v3088_v20, %v2196_v13 }
 0x910   :  { %v2207_v28 = vadd.f32 %v3088_v20, %v2195_v45 }
 0x911   :  { %v2230_v57 = vsel %vm205_vm0, %v2208_v49, 0.0 }
 0x912   :  { %2225 = vadd.xlane.f32.xlu0 %v2224_v53  ;;  %v2227_v39 = vsel %vm205_vm0, %v2207_v28, 0.0 }
 0x916   :  { %2222 = vadd.xlane.f32.xlu0 %v2221_v36 }
 0x91a   :  { %2228 = vadd.xlane.f32.xlu0 %v2227_v39 }
 0x91e   :  { %2231 = vadd.xlane.f32.xlu0 %v2230_v57 }
 0x993   :  { %v2214_v27 = vpop.xlane.xlu0 %2213 }
 0x994   :  { %v2235_v44 = vmul.f32 0.03125, %v2214_v27  ;;  %v2211_v22 = vpop.xlane.xlu1 %2210 }
 0x995   :  { %v2234_v55 = vmul.f32 0.03125, %v2211_v22 }
 0x996   :  { %v5279_v62 = vsub.f32 %v2202_v8, %v2235_v44 }
 0x997   :  { %v5281_v9 = vsub.f32 %v2201_v4, %v2234_v55  ;;  %v2220_v60 = vpop.xlane.xlu0 %2219  ;;  %v3089_v55 = vld [vmem:[%s5499_s1 + $0x182] ss:$0 sm:$0xff] }
 0x998   :  { %v2237_v54 = vmul.f32 0.03125, %v2220_v60  ;;  %v2251_v52 = vmul.f32 %v5279_v62, %v5279_v62 }
 0x999   :  { %v2250_v47 = vmul.f32 %v5281_v9, %v5281_v9 }
 0x99a   :  { %v5285_v58 = vsub.f32 %v2204_v41, %v2237_v54  ;;  %v2261_v51 = vsel %vm205_vm0, %v2251_v52, 0.0  ;;  %v4381_v41 = vmov 0.0|0.0  }
 0x99b   :  { %v2217_v48 = vpop.xlane.xlu0 %2216  ;;  %2262 = vadd.xlane.f32.xlu0 %v2261_v51  ;;  %v2258_v46 = vsel %vm205_vm0, %v2250_v47, 0.0  ;;  %3948 = vmatprep.subr.bf16.mxu0 %v4381_v41 }
 0x99c   :  { %v2236_v19 = vmul.f32 0.03125, %v2217_v48  ;;  %v2253_v2 = vmul.f32 %v5285_v58, %v5285_v58  ;;  %3978 = vmatprep.subr.bf16.mxu1 %v4381_v41 }
 0x99e   :  { %v5290_v17 = vsub.f32 %v2203_v34, %v2236_v19  ;;  %v2267_v42 = vsel %vm205_vm0, %v2253_v2, 0.0  ;;  %v36_v34 = vld [vmem:[%s5499_s1 + $0xc0] sm:$0xff] }
 0x99f   :  { %v2226_v23 = vpop.xlane.xlu0 %2225  ;;  %2259 = vadd.xlane.f32.xlu0 %v2258_v46  ;;  %v3979_v11 = vpack.c.bf16 %v37_v29, %v36_v34  ;;  %v3090_v19 = vld [vmem:[%s5499_s1 + $0x183] ss:$0 sm:$0xff] }
 0x9a0   :  { %v2239_v37 = vmul.f32 0.03125, %v2226_v23  ;;  %v2252_v32 = vmul.f32 %v5290_v17, %v5290_v17 }
 0x9a1   :  { %3980 = vmatpush3.bf16.msra.mxu1 %v3979_v11 }
 0x9a2   :  { %v5297_v43 = vsub.f32 %v2206_v35, %v2239_v37  ;;  %v2264_v24 = vsel %vm205_vm0, %v2252_v32, 0.0  ;;  %3981 = vmatprep.subr.bf16.mxu1 %v4381_v41 }
 0x9a3   :  { %2265 = vadd.xlane.f32.xlu1 %v2264_v24  ;;  %v2223_v20 = vpop.xlane.xlu0 %2222  ;;  %2268 = vadd.xlane.f32.xlu0 %v2267_v42 }
 0x9a4   :  { %v2238_v7 = vmul.f32 0.03125, %v2223_v20  ;;  %v2255_v40 = vmul.f32 %v5297_v43, %v5297_v43 }
 0x9a5   :  { %3983 = vmatpush3.bf16.msra.mxu1 %v3982_v3 }
 0x9a6   :  { %v5303_v61 = vsub.f32 %v2205_v5, %v2238_v7  ;;  %v2273_v31 = vsel %vm205_vm0, %v2255_v40, 0.0  ;;  %3990 = vmatprep.subr.bf16.mxu1 %v4381_v41 }
 0x9a7   :  { %2274 = vadd.xlane.f32.xlu0 %v2273_v31  ;;  %v2229_v59 = vpop.xlane.xlu0 %2228 }
 0x9a8   :  { %v2240_v1 = vmul.f32 0.03125, %v2229_v59  ;;  %v2254_v8 = vmul.f32 %v5303_v61, %v5303_v61 }
 0x9aa   :  { %v5308_v4 = vsub.f32 %v2207_v28, %v2240_v1  ;;  %v2270_v21 = vsel %vm205_vm0, %v2254_v8, 0.0 }
 0x9ab   :  { %2271 = vadd.xlane.f32.xlu1 %v2270_v21  ;;  %v2232_v26 = vpop.xlane.xlu0 %2231 }
 0x9ac   :  { %v2241_v38 = vmul.f32 0.03125, %v2232_v26  ;;  %v2256_v12 = vmul.f32 %v5308_v4, %v5308_v4 }
 0x9ae   :  { %v5313_v25 = vsub.f32 %v2208_v49, %v2241_v38  ;;  %v2276_v14 = vsel %vm205_vm0, %v2256_v12, 0.0 }
 0x9af   :  { %2277 = vadd.xlane.f32.xlu1 %v2276_v14 }
 0x9b0   :  { %v2257_v18 = vmul.f32 %v5313_v25, %v5313_v25 }
 0x9b2   :  { %v2279_v6 = vsel %vm205_vm0, %v2257_v18, 0.0 }
 0x9b3   :  { %2280 = vadd.xlane.f32.xlu0 %v2279_v6 }
 0xa28   :  { %v2263_v50 = vpop.xlane.xlu0 %2262 }
 0xa29   :  { %v2283_v56 = vmul.f32 0.03125, %v2263_v50 }
 0xa2b   :  { %v2291_v35 = vadd.f32 1e-05, %v2283_v56 }
 0xa2c   :  { %v2260_v30 = vpop.xlane.xlu0 %2259 }
 0xa2d   :  { %4327 = vrsqrt.f32 %v2291_v35  ;;  %v2282_v13 = vmul.f32 0.03125, %v2260_v30  ;;  %v94_v35 = vld [vmem:[%s5498_s0 + $0x80] sm:$0x3]  ;;  %v41_v30 = vld [vmem:[%s5499_s1 + $0xe8] sm:$0xff] }
 0xa2f   :  { %v2290_v63 = vadd.f32 1e-05, %v2282_v13  ;;  %v42_v13 = vld [vmem:[%s5499_s1 + $0xf0] sm:$0xff] }
 0xa30   :  { %v2266_v16 = vpop.xlane.xlu1 %2265  ;;  %v2269_v15 = vpop.xlane.xlu0 %2268 }
 0xa31   :  { %4329 = vrsqrt.f32 %v2290_v63  ;;  %v2284_v45 = vmul.f32 0.03125, %v2266_v16  ;;  %v2285_v5 = vmul.f32 0.03125, %v2269_v15  ;;  %v43_v16 = vld [vmem:[%s5499_s1 + $0xf8] sm:$0xff] }
 0xa32   :  { %v3976_v15 = vpack.c.bf16 %v43_v16, %v42_v13  ;;  %v55_v16 = vld [vmem:[%s5499_s1 + $0x158] sm:$0xff] }
 0xa33   :  { %v2292_v53 = vadd.f32 1e-05, %v2284_v45  ;;  %v2293_v28 = vadd.f32 1e-05, %v2285_v5 }
 0xa34   :  { %v2275_v36 = vpop.xlane.xlu0 %2274 }
 0xa35   :  { %4331 = vrsqrt.f32 %v2292_v53  ;;  %v2287_v49 = vmul.f32 0.03125, %v2275_v36 }
 0xa36   :  { %4333 = vrsqrt.f32 %v2293_v28 }
 0xa37   :  { %v4328_v39 = vpop.eup %4327  ;;  %v2295_v57 = vadd.f32 1e-05, %v2287_v49 }
 0xa38   :  { %v2307_v27 = vmul.f32 %v4328_v39, %v5279_v62  ;;  %v2272_v44 = vpop.xlane.xlu1 %2271  ;;  %v3095_v39 = vld [vmem:[%s5499_s1 + $0x184] ss:$0 sm:$0xff] }
 0xa39   :  { %4335 = vrsqrt.f32 %v2295_v57  ;;  %v2286_v22 = vmul.f32 0.03125, %v2272_v44 }
 0xa3a   :  { %v2319_v47 = vmul.f32 %v3089_v55, %v2307_v27 }
 0xa3b   :  { %v4330_v60 = vpop.eup %4329  ;;  %v2294_v54 = vadd.f32 1e-05, %v2286_v22 }
 0xa3c   :  { %v2306_v52 = vmul.f32 %v4330_v60, %v5281_v9  ;;  %v2278_v51 = vpop.xlane.xlu1 %2277  ;;  %v2331_v42 = vadd.f32 %v3090_v19, %v2319_v47 }
 0xa3d   :  { %4337 = vrsqrt.f32 %v2294_v54  ;;  %v2288_v48 = vmul.f32 0.03125, %v2278_v51 }
 0xa3e   :  { %v2318_v62 = vmul.f32 %v3089_v55, %v2306_v52 }
 0xa3f   :  { %v4332_v46 = vpop.eup %4331  ;;  %v2296_v2 = vadd.f32 1e-05, %v2288_v48  ;;  %v44_v48 = vld [vmem:[%s5499_s1 + $0x100] sm:$0xff] }
 0xa40   :  { %v4334_v23 = vpop.eup %4333  ;;  %v2308_v37 = vmul.f32 %v4332_v46, %v5290_v17  ;;  %v2281_v32 = vpop.xlane.xlu0 %2280  ;;  %v2330_v24 = vadd.f32 %v3090_v19, %v2318_v62  ;;  %v46_v62 = vld [vmem:[%s5499_s1 + $0x110] sm:$0xff] }
 0xa41   :  { %v2309_v20 = vmul.f32 %v4334_v23, %v5285_v58  ;;  %4339 = vrsqrt.f32 %v2296_v2  ;;  %v2289_v9 = vmul.f32 0.03125, %v2281_v32  ;;  %v47_v2 = vld [vmem:[%s5499_s1 + $0x118] sm:$0xff] }
 0xa42   :  { %v3949_v7 = vpack.c.bf16 %v2331_v42, %v2330_v24  ;;  %v2320_v40 = vmul.f32 %v3089_v55, %v2308_v37  ;;  %v3988_v23 = vpack.c.bf16 %v47_v2, %v46_v62 }
 0xa43   :  { %v4336_v31 = vpop.eup %4335  ;;  %v2297_v59 = vadd.f32 1e-05, %v2289_v9  ;;  %v2321_v1 = vmul.f32 %v3089_v55, %v2309_v20  ;;  %v3096_v20 = vld [vmem:[%s5499_s1 + $0x185] ss:$0 sm:$0xff] }
 0xa44   :  { %v2311_v8 = vmul.f32 %v4336_v31, %v5297_v43  ;;  %3950 = vmatpush3.bf16.msra.mxu0 %v3949_v7  ;;  %v2332_v21 = vadd.f32 %v3090_v19, %v2320_v40 }
 0xa45   :  { %4341 = vrsqrt.f32 %v2297_v59  ;;  %3951 = vmatprep.subr.bf16.mxu0 %v4381_v41  ;;  %v2333_v17 = vadd.f32 %v3090_v19, %v2321_v1  ;;  %v3098_v59 = vld [vmem:[%s5499_s1 + $0x187] ss:$0 sm:$0xff] }
 0xa46   :  { %v2323_v58 = vmul.f32 %v3089_v55, %v2311_v8 }
 0xa47   :  { %v4338_v26 = vpop.eup %4337  ;;  %v3952_v38 = vpack.c.bf16 %v2333_v17, %v2332_v21 }
 0xa48   :  { %v2310_v12 = vmul.f32 %v4338_v26, %v5303_v61  ;;  %v2335_v43 = vadd.f32 %v3090_v19, %v2323_v58 }
 0xa49   :  { %3953 = vmatpush3.bf16.msra.mxu0 %v3952_v38 }
 0xa4a   :  { %3954 = vmatprep.subr.bf16.mxu0 %v4381_v41  ;;  %v2322_v14 = vmul.f32 %v3089_v55, %v2310_v12 }
 0xa4b   :  { %v4340_v18 = vpop.eup %4339 }
 0xa4c   :  { %v2312_v6 = vmul.f32 %v4340_v18, %v5308_v4  ;;  %v2334_v34 = vadd.f32 %v3090_v19, %v2322_v14  ;;  %v95_v4 = vld [vmem:[%s5498_s0 + $0x82] sm:$0x3] }
 0xa4e   :  { %v3955_v29 = vpack.c.bf16 %v2335_v43, %v2334_v34  ;;  %v2324_v10 = vmul.f32 %v3089_v55, %v2312_v6 }
 0xa4f   :  { %v4342_v0 = vpop.eup %4341 }
 0xa50   :  { %v2313_v11 = vmul.f32 %v4342_v0, %v5313_v25  ;;  %3956 = vmatpush3.bf16.msra.mxu0 %v3955_v29  ;;  %v2336_v61 = vadd.f32 %v3090_v19, %v2324_v10  ;;  %v40_v25 = vld [vmem:[%s5499_s1 + $0xe0] sm:$0xff] }
 0xa51   :  { %3957 = vmatprep.subr.bf16.mxu0 %v4381_v41  ;;  %v3973_v63 = vpack.c.bf16 %v41_v30, %v40_v25  ;;  %v52_v25 = vld [vmem:[%s5499_s1 + $0x140] sm:$0xff]  ;;  %v53_v30 = vld [vmem:[%s5499_s1 + $0x148] sm:$0xff] }
 0xa52   :  { %v2325_v3 = vmul.f32 %v3089_v55, %v2313_v11  ;;  %v3997_v13 = vpack.c.bf16 %v53_v30, %v52_v25 }
 0xa54   :  { %v2337_v50 = vadd.f32 %v3090_v19, %v2325_v3  ;;  %v45_v19 = vld [vmem:[%s5499_s1 + $0x108] sm:$0xff]  ;;  %v48_v3 = vld [vmem:[%s5499_s1 + $0x120] sm:$0xff] }
 0xa55   :  { %v3985_v46 = vpack.c.bf16 %v45_v19, %v44_v48 }
 0xa56   :  { %v3958_v56 = vpack.c.bf16 %v2337_v50, %v2336_v61  ;;  %v49_v61 = vld [vmem:[%s5499_s1 + $0x128] sm:$0xff] }
 0xa57   :  { %v3991_v50 = vpack.c.bf16 %v49_v61, %v48_v3 }
 0xa58   :  { %3959 = vmatpush3.bf16.msra.mxu0 %v3958_v56 }
 0xa59   :  { %3960 = vmatprep.subr.bf16.mxu0 %v4381_v41 }
 0xa5b   :  { %3656 = vmatmul.mubr.msk.f32.vlgmr.msra.gmra.mrb[32].mxu0 %vm520_vm2, %v94_v35  ;;  %v51_v35 = vld [vmem:[%s5499_s1 + $0x138] sm:$0xff] }
 0xa5c   :  { %3962 = vmatpush3.bf16.msra.mxu0 %v3949_v7  ;;  %3674 = vmatprep.mubr.msk.f32.mxu0 %vm4382_vm3, %v4383_v33  ;;  %v3097_v7 = vld [vmem:[%s5499_s1 + $0x186] ss:$0 sm:$0xff] }
 0xa5d   :  { %3963 = vmatprep.subr.bf16.mxu0 %v4381_v41 }
 0xa60   :  { %3965 = vmatpush3.bf16.msra.mxu0 %v3952_v38 }
 0xa61   :  { %3966 = vmatprep.subr.bf16.mxu0 %v4381_v41 }
 0xa64   :  { %3968 = vmatpush3.bf16.msra.mxu0 %v3955_v29 }
 0xa65   :  { %3969 = vmatprep.subr.bf16.mxu0 %v4381_v41 }
 0xa68   :  { %3971 = vmatpush3.bf16.msra.mxu0 %v3958_v56  ;;  %v50_v56 = vld [vmem:[%s5499_s1 + $0x130] sm:$0xff] }
 0xa69   :  { %3972 = vmatprep.subr.bf16.mxu0 %v4381_v41 }
 0xa6b   :  { %3675 = vmatmul.mubr.msk.f32.vlgmr.msra.gmra.mrb[34].mxu0 %vm520_vm2, %v95_v4  ;;  %v3994_v4 = vpack.c.bf16 %v51_v35, %v50_v56 }
 0xa6c   :  { %3685 = vmatprep.mubr.msk.f32.mxu0 %vm4382_vm3, %v4383_v33  ;;  %3974 = vmatpush3.bf16.msra.mxu0 %v3973_v63  ;;  %v54_v63 = vld [vmem:[%s5499_s1 + $0x150] sm:$0xff] }
 0xa6d   :  { %3975 = vmatprep.subr.bf16.mxu0 %v4381_v41 }
 0xa70   :  { %3977 = vmatpush3.bf16.msra.mxu0 %v3976_v15  ;;  %v4000_v15 = vpack.c.bf16 %v55_v16, %v54_v63 }
 0xa71   :  { %3984 = vmatprep.subr.bf16.mxu0 %v4381_v41 }
 0xb2e   :  { %v2407_v45 = vpop.f32.mrb[32].mxu0 }
 0xb2f   :  { %v3657_v5 = vpop.f32.mrb[33].mxu0  ;;  %3697 = vmatmul.mubr.msk.f32.vlgmr.msra.gmra.mrb[32].mxu1 %vm205_vm0, %v2407_v45 }
 0xb30   :  { %3726 = vmatprep.mubr.msk.f32.mxu1 %vm4382_vm3, %v4383_v33  ;;  %3992 = vmatpush3.bf16.msra.mxu1 %v3991_v50 }
 0xb31   :  { %3993 = vmatprep.subr.bf16.mxu1 %v4381_v41 }
 0xb34   :  { %3995 = vmatpush3.bf16.msra.mxu1 %v3994_v4 }
 0xb35   :  { %3996 = vmatprep.subr.bf16.mxu1 %v4381_v41 }
 0xb38   :  { %3998 = vmatpush3.bf16.msra.mxu1 %v3997_v13 }
 0xb39   :  { %3999 = vmatprep.subr.bf16.mxu1 %v4381_v41 }
 0xb3c   :  { %4001 = vmatpush3.bf16.msra.mxu1 %v4000_v15 }
 0xb3e   :  { %v2480_v53 = vpop.f32.mrb[34].mxu0 }
 0xb3f   :  { %v3676_v28 = vpop.f32.mrb[35].mxu0  ;;  %3686 = vmatmul.mubr.msk.f32.vlgmr.msra.gmra.mrb[36].mxu0 %vm205_vm0, %v2480_v53 }
 0xb40   :  { %3707 = vmatprep.mubr.msk.f32.mxu0 %vm4382_vm3, %v4383_v33  ;;  %3986 = vmatpush3.bf16.msra.mxu0 %v3985_v46 }
 0xb41   :  { %3987 = vmatprep.subr.bf16.mxu0 %v4381_v41 }
 0xb44   :  { %3989 = vmatpush3.bf16.msra.mxu0 %v3988_v23 }
 0xb45   :  { %4002 = vmatprep.subr.bf16.mxu0 %v4381_v41 }
 0xc02   :  { %v2626_v36 = vpop.f32.mrb[32].mxu1 }
 0xc03   :  { %v3698_v49 = vpop.f32.mrb[33].mxu1 }
 0xc12   :  { %v2553_v57 = vpop.f32.mrb[36].mxu0 }
 0xc13   :  { %v2627_v27 = vadd.f32 %v2626_v36, %v2553_v57  ;;  %v3687_v44 = vpop.f32.mrb[37].mxu0  ;;  %v3100_v36 = vld [vmem:[%s5499_s1 + $0x188] ss:$0 sm:$0xff] }
 0xc14   :  { %v3102_v44 = vld [vmem:[%s5499_s1 + $0x18a] ss:$0 sm:$0xff] }
 0xc15   :  { %v2634_v22 = vadd.f32 %v3095_v39, %v2627_v27  ;;  %v3101_v39 = vld [vmem:[%s5499_s1 + $0x189] ss:$0 sm:$0xff] }
 0xc17   :  { %v2636_v55 = vsel %vm2635_vm4, %v2634_v22, 0.0 }
 0xc18   :  { %2637 = vadd.xlane.f32.xlu1 %v2636_v55 }
 0xca5   :  { %v2638_v60 = vpop.xlane.xlu1 %2637 }
 0xca6   :  { %v2639_v54 = vmul.f32 0.03125, %v2638_v60 }
 0xca8   :  { %v2640_v52 = vsub.f32 %v2634_v22, %v2639_v54 }
 0xcaa   :  { %v2641_v51 = vmul.f32 %v2640_v52, %v2640_v52 }
 0xcac   :  { %v2642_v47 = vsel %vm2635_vm4, %v2641_v51, 0.0 }
 0xcad   :  { %2643 = vadd.xlane.f32.xlu0 %v2642_v47 }
 0xd3a   :  { %v2644_v37 = vpop.xlane.xlu0 %2643 }
 0xd3b   :  { %v2645_v32 = vmul.f32 0.03125, %v2644_v37 }
 0xd3d   :  { %v2646_v24 = vadd.f32 1e-05, %v2645_v32 }
 0xd3f   :  { %4343 = vrsqrt.f32 %v2646_v24 }
 0xd49   :  { %v4344_v42 = vpop.eup %4343 }
 0xd4a   :  { %v2648_v9 = vmul.f32 %v4344_v42, %v2640_v52 }
 0xd4c   :  { %v2653_v40 = vmul.f32 %v3096_v20, %v2648_v9  ;;  %v56_v9 = vld [vmem:[%s5499_s1 + $0x160] sm:$0xff] }
 0xd4e   :  { %v2658_v31 = vadd.f32 %v3097_v7, %v2653_v40  ;;  %v57_v7 = vld [vmem:[%s5499_s1 + $0x168] sm:$0xff]  ;;  %v58_v40 = vld [vmem:[%s5499_s1 + $0x170] sm:$0xff] }
 0xd50   :  { %3708 = vmatmul.mubr.msk.f32.vlgmr.msra.gmra.mrb[38].mxu0 %vm205_vm0, %v2658_v31  ;;  %v4003_v31 = vpack.c.bf16 %v57_v7, %v56_v9 }
 0xd51   :  { %3737 = vmatprep.mubr.msk.f32.mxu0 %vm4382_vm3, %v4383_v33 }
 0xd52   :  { %4004 = vmatpush3.bf16.msra.mxu0 %v4003_v31 }
 0xd53   :  { %4005 = vmatprep.subr.bf16.mxu0 %v4381_v41  ;;  %v3106_v41 = vld [vmem:[%s5499_s1 + $0x18d] ss:$0 sm:$0xff] }
 0xe23   :  { %v2732_v1 = vpop.f32.mrb[38].mxu0 }
 0xe24   :  { %v2733_v8 = vadd.f32 %v3098_v59, %v2732_v1  ;;  %v3709_v21 = vpop.f32.mrb[39].mxu0  ;;  %v59_v59 = vld [vmem:[%s5499_s1 + $0x178] sm:$0xff] }
 0xe25   :  { %v4006_v1 = vpack.c.bf16 %v59_v59, %v58_v40 }
 0xe26   :  { %v2737_v17 = vmul.f32 0.044715, %v2733_v8  ;;  %v2736_v18 = vmul.f32 0.5, %v2733_v8 }
 0xe27   :  { %4007 = vmatpush3.bf16.msra.mxu0 %v4006_v1 }
 0xe28   :  { %v2738_v26 = vmul.f32 %v2737_v17, %v2733_v8 }
 0xe2a   :  { %v2739_v38 = vmul.f32 %v2738_v26, %v2733_v8 }
 0xe2c   :  { %v2740_v12 = vadd.f32 %v2739_v38, %v2733_v8  ;;  %v3104_v38 = vld [vmem:[%s5499_s1 + $0x18b] ss:$0 sm:$0xff] }
 0xe2e   :  { %v2741_v58 = vmul.f32 0.7978846, %v2740_v12 }
 0xe30   :  { %4345 = vtanh.f32 %v2741_v58  ;;  %v3105_v58 = vld [vmem:[%s5499_s1 + $0x18c] ss:$0 sm:$0xff] }
 0xe3a   :  { %v4346_v14 = vpop.eup %4345 }
 0xe3b   :  { %v2743_v6 = vadd.f32 1.0, %v4346_v14 }
 0xe3d   :  { %v2744_v34 = vmul.f32 %v2743_v6, %v2736_v18 }
 0xe3f   :  { %v2746_v43 = vsel %vm2745_vm5, %v2744_v34, 0.0 }
 0xe40   :  { %2747 = vadd.xlane.f32.xlu1 %v2746_v43 }
 0xecd   :  { %v2748_v33 = vpop.xlane.xlu1 %2747 }
 0xece   :  { %v2750_v29 = vmul.f32 0.015625, %v2748_v33 }
 0xed0   :  { %v2751_v0 = vsub.f32 %v2744_v34, %v2750_v29 }
 0xed2   :  { %v2752_v11 = vmul.f32 %v2751_v0, %v2751_v0 }
 0xed4   :  { %v2753_v10 = vsel %vm2745_vm5, %v2752_v11, 0.0 }
 0xed5   :  { %2754 = vadd.xlane.f32.xlu0 %v2753_v10 }
 0xf62   :  { %v2755_v45 = vpop.xlane.xlu0 %2754 }
 0xf63   :  { %v2756_v5 = vmul.f32 0.015625, %v2755_v45 }
 0xf65   :  { %v2757_v53 = vadd.f32 1e-05, %v2756_v5 }
 0xf67   :  { %4347 = vrsqrt.f32 %v2757_v53 }
 0xf71   :  { %v4348_v28 = vpop.eup %4347 }
 0xf72   :  { %v2759_v49 = vmul.f32 %v4348_v28, %v2751_v0 }
 0xf74   :  { %v2764_v57 = vmul.f32 %v3100_v36, %v2759_v49 }
 0xf76   :  { %v2769_v27 = vadd.f32 %v3101_v39, %v2764_v57 }
 0xf78   :  { %3727 = vmatmul.mubr.msk.f32.vlgmr.msra.gmra.mrb[34].mxu1 %vm520_vm2, %v2769_v27 }
0x104b   :  { %v2843_v22 = vpop.f32.mrb[34].mxu1 }
0x104c   :  { %v2844_v55 = vadd.f32 %v3102_v44, %v2843_v22  ;;  %v3728_v60 = vpop.f32.mrb[35].mxu1 }
0x104e   :  { %v2848_v54 = vmul.f32 0.044715, %v2844_v55  ;;  %v2847_v62 = vmul.f32 0.5, %v2844_v55 }
0x1050   :  { %v2849_v52 = vmul.f32 %v2848_v54, %v2844_v55 }
0x1052   :  { %v2850_v51 = vmul.f32 %v2849_v52, %v2844_v55 }
0x1054   :  { %v2851_v47 = vadd.f32 %v2850_v51, %v2844_v55 }
0x1056   :  { %v2852_v48 = vmul.f32 0.7978846, %v2851_v47 }
0x1058   :  { %4349 = vtanh.f32 %v2852_v48 }
0x1062   :  { %v4350_v19 = vpop.eup %4349 }
0x1063   :  { %v2854_v46 = vadd.f32 1.0, %v4350_v19 }
0x1065   :  { %v2855_v2 = vmul.f32 %v2854_v46, %v2847_v62 }
0x1067   :  { %v2856_v23 = vsel %vm2635_vm4, %v2855_v2, 0.0 }
0x1068   :  { %2857 = vadd.xlane.f32.xlu1 %v2856_v23 }
0x10f5   :  { %v2858_v37 = vpop.xlane.xlu1 %2857 }
0x10f6   :  { %v2859_v32 = vmul.f32 0.03125, %v2858_v37 }
0x10f8   :  { %v2860_v24 = vsub.f32 %v2855_v2, %v2859_v32 }
0x10fa   :  { %v2861_v42 = vmul.f32 %v2860_v24, %v2860_v24 }
0x10fc   :  { %v2862_v20 = vsel %vm2635_vm4, %v2861_v42, 0.0 }
0x10fd   :  { %2863 = vadd.xlane.f32.xlu0 %v2862_v20 }
0x118a   :  { %v2864_v8 = vpop.xlane.xlu0 %2863 }
0x118b   :  { %v2865_v21 = vmul.f32 0.03125, %v2864_v8 }
0x118d   :  { %v2866_v17 = vadd.f32 1e-05, %v2865_v21 }
0x118f   :  { %4351 = vrsqrt.f32 %v2866_v17 }
0x1199   :  { %v4352_v26 = vpop.eup %4351 }
0x119a   :  { %v2868_v12 = vmul.f32 %v4352_v26, %v2860_v24 }
0x119c   :  { %v2873_v14 = vmul.f32 %v3104_v38, %v2868_v12 }
0x119e   :  { %v2878_v18 = vadd.f32 %v3105_v58, %v2873_v14 }
0x11a0   :  { %3738 = vmatmul.mubr.msk.f32.vlgmr.msra.gmra.mrb[40].mxu0 %vm205_vm0, %v2878_v18 }
0x1273   :  { %v2952_v6 = vpop.f32.mrb[40].mxu0 }
0x1274   :  { %v2953_v34 = vadd.f32 %v3106_v41, %v2952_v6  ;;  %v3739_v43 = vpop.f32.mrb[41].mxu0 }
0x1276   :  { %2956 = vst [vmem:[#allocation2] sm:$0x3] %v2953_v34 }
0x1277   :  { %4365 = shalt.err (!%p4362_p4)
}
0x1278   :  { %s4366_s16 = scalar_lea.hbm %s5500_s2, 32 }
0x1279   :  { %p4367_p5 = scmp.ne.s32.totalorder %s5500_s2, %s4366_s16  ;;  %p4370_p6 = scmp.lt.u32.totalorder %s4366_s16, %s5500_s2 }
0x127b   :  { %p4372_p7 = pnand %p4370_p6, %p4367_p5 }
0x127d   :  { %4375 = shalt.err (!%p4372_p7)
}
0x127e   :  { %2966 = dma.vmem_to_hbm [thread:$0]  %s2964_s13, 32, %s5500_s2, [#allocation3]  }
0x127f   :  { %4376 = dma.done.wait [#allocation3], 32  }
0x1280   :  { %4377 = vsyncadd [#allocation3], 4294967264 }
0x1281   :  { %2970 = vsyncpa [#allocation3], 1 }

</bundles_post_ra>
